<compile_context>
chip_gen: v5e
topology: v5e:2x2
jax: 0.10.0
libtpu: 0.0.40
codegen_flags: <defaults>
</compile_context>

<pallas_src>
import functools

import jax
import jax.numpy as jnp
import numpy as np
from jax.experimental import pallas as pl
from jax.experimental.pallas import tpu as pltpu


# ---------------------------------------------------------------------------
# helpers
# ---------------------------------------------------------------------------
def _round_up(x, m):
    return (x + m - 1) // m * m


def _largest_divisor(n, upper, step=8):
    """Largest multiple of `step` that divides n and is <= max(upper, step)."""
    d = min(n, max(upper, step))
    d -= d % step
    d = max(d, step)
    while n % d != 0:
        d -= step
    return d


# ---------------------------------------------------------------------------
# Stage 1: bulk input projection  Gi = x @ W_i + b_i   (one big GEMM)
# ---------------------------------------------------------------------------
def _input_proj_kernel(x_ref, w_ref, b_ref, out_ref):
    out_ref[...] = (
        jnp.dot(x_ref[...], w_ref[...], preferred_element_type=jnp.float32)
        + b_ref[...]
    ).astype(out_ref.dtype)


# ---------------------------------------------------------------------------
# Stage 2: sequential GRU recurrence.  One grid step == Tb timesteps.
#   grid = (num_batch_blocks, num_time_blocks); time axis is "arbitrary".
#   out_ref (index constant along time) is the resident recurrent state.
# ---------------------------------------------------------------------------
def _gru_recurrent_kernel(lens_ref, gi_ref, wh_ref, bh_ref, out_ref, *, Hp, Tb):
    tb = pl.program_id(1)

    @pl.when(tb == 0)
    def _():
        out_ref[...] = jnp.zeros_like(out_ref)

    h0 = out_ref[...]                       # [Bb, Hp] f32 recurrent state
    # Hoisted per-block loads (not re-materialized per unrolled step).
    wh = wh_ref[...]                        # [Hp, 3Hp] bf16 (resident)
    bh = bh_ref[...]                        # [1, 3Hp]  f32
    rel = lens_ref[...] - tb * Tb           # [Bb, 1] steps remaining in block

    def step(k, h):
        g = gi_ref[k]                       # [Bb, 3Hp] precomputed x-projection
        gh = jnp.dot(h.astype(wh.dtype), wh,
                     preferred_element_type=jnp.float32) + bh
        # PyTorch nn.GRU gate order (r, z, n); n uses r * (h @ W_hn + b_hn).
        r = jax.nn.sigmoid(g[:, :Hp] + gh[:, :Hp])
        z = jax.nn.sigmoid(g[:, Hp:2 * Hp] + gh[:, Hp:2 * Hp])
        n = jnp.tanh(g[:, 2 * Hp:] + r * gh[:, 2 * Hp:])
        h_new = (1.0 - z) * n + z * h
        # packed-sequence semantics: freeze state once t >= ulens[b]
        return jnp.where(k < rel, h_new, h)

    out_ref[...] = jax.lax.fori_loop(0, Tb, step, h0, unroll=True)


# ---------------------------------------------------------------------------
# Wrapper: embedding lookup + layout glue + the two pallas_calls.
# ---------------------------------------------------------------------------
def u_encoder_forward(utterances, ulens, params, *, time_block=8,
                      max_batch_block=64):
    emb = params["embedding"]
    B, T = utterances.shape
    E = emb.shape[1]
    H = params["w_hr"].shape[0]

    Hp = _round_up(H, 128)                  # lane-dense gates / output
    B_pad = _round_up(B, 8)                 # f32 sublane alignment
    Tb = time_block
    T_pad = _round_up(T, Tb)

    # --- fuse + pad + cast weights (per-gate padding keeps slices aligned) --
    pad_i = lambda w: jnp.pad(w, ((0, 0), (0, Hp - H)))
    pad_h = lambda w: jnp.pad(w, ((0, Hp - H), (0, Hp - H)))
    pad_b = lambda b: jnp.pad(b, ((0, 0), (0, Hp - H)))
    W_i = jnp.concatenate(
        [pad_i(params["w_ir"]), pad_i(params["w_iz"]), pad_i(params["w_in"])],
        axis=1).astype(jnp.bfloat16)                      # [E, 3Hp]
    W_h = jnp.concatenate(
        [pad_h(params["w_hr"]), pad_h(params["w_hz"]), pad_h(params["w_hn"])],
        axis=1).astype(jnp.bfloat16)                      # [Hp, 3Hp]
    b_i = jnp.concatenate(
        [pad_b(params["b_ir"]), pad_b(params["b_iz"]), pad_b(params["b_in"])],
        axis=1).astype(jnp.float32)                       # [1, 3Hp]
    b_h = jnp.concatenate(
        [pad_b(params["b_hr"]), pad_b(params["b_hz"]), pad_b(params["b_hn"])],
        axis=1).astype(jnp.float32)                       # [1, 3Hp]

    # --- embedding gather, bf16, time-major, padded -------------------------
    x = jnp.take(emb, utterances, axis=0).astype(jnp.bfloat16)   # [B, T, E]
    x = jnp.pad(x, ((0, B_pad - B), (0, T_pad - T), (0, 0)))
    x = jnp.transpose(x, (1, 0, 2))                              # [T_pad, B_pad, E]
    rows = T_pad * B_pad
    x2d = x.reshape(rows, E)

    # --- Stage 1: one large GEMM for all input projections ------------------
    Rb = _largest_divisor(rows, 256)
    gi = pl.pallas_call(
        _input_proj_kernel,
        out_shape=jax.ShapeDtypeStruct((rows, 3 * Hp), jnp.float32),
        grid_spec=pltpu.PrefetchScalarGridSpec(
            num_scalar_prefetch=0,
            grid=(rows // Rb,),
            in_specs=[
                pl.BlockSpec((Rb, E), lambda i: (i, 0)),
                pl.BlockSpec((E, 3 * Hp), lambda i: (0, 0)),
                pl.BlockSpec((1, 3 * Hp), lambda i: (0, 0)),
            ],
            out_specs=pl.BlockSpec((Rb, 3 * Hp), lambda i: (i, 0)),
        ),
        compiler_params=pltpu.CompilerParams(
            dimension_semantics=("parallel",),
            vmem_limit_bytes=32 * 1024 * 1024,
        ),
    )(x2d, W_i, b_i)
    gi = gi.reshape(T_pad, B_pad, 3 * Hp)

    # --- Stage 2: sequential recurrence --------------------------------------
    lens2d = jnp.pad(ulens.astype(jnp.int32), (0, B_pad - B)).reshape(B_pad, 1)
    Bb = _largest_divisor(B_pad, max_batch_block)
    NB, NT = B_pad // Bb, T_pad // Tb

    out = pl.pallas_call(
        functools.partial(_gru_recurrent_kernel, Hp=Hp, Tb=Tb),
        out_shape=jax.ShapeDtypeStruct((B_pad, Hp), jnp.float32),
        grid_spec=pltpu.PrefetchScalarGridSpec(
            num_scalar_prefetch=0,
            grid=(NB, NT),
            in_specs=[
                pl.BlockSpec((Bb, 1), lambda bi, tb: (bi, 0)),           # ulens
                pl.BlockSpec((Tb, Bb, 3 * Hp), lambda bi, tb: (tb, bi, 0)),  # Gi
                pl.BlockSpec((Hp, 3 * Hp), lambda bi, tb: (0, 0)),       # W_h
                pl.BlockSpec((1, 3 * Hp), lambda bi, tb: (0, 0)),        # b_h
            ],
            out_specs=pl.BlockSpec((Bb, Hp), lambda bi, tb: (bi, 0)),
        ),
        compiler_params=pltpu.CompilerParams(
            dimension_semantics=("parallel", "arbitrary"),
            vmem_limit_bytes=32 * 1024 * 1024,
        ),
    )(lens2d, gi, W_h, b_h)

    return out[:B, :H]


# ---------------------------------------------------------------------------
# Pure-JAX reference (same math, same bf16 matmul operands / f32 accumulate).
# ---------------------------------------------------------------------------
def u_encoder_reference(utterances, ulens, params):
    emb = params["embedding"]
    H = params["w_hr"].shape[0]
    x = jnp.take(emb, utterances, axis=0)                       # [B, T, E] f32
    B, T, E = x.shape

    W_i = jnp.concatenate([params["w_ir"], params["w_iz"], params["w_in"]],
                          axis=1).astype(jnp.bfloat16)
    W_h = jnp.concatenate([params["w_hr"], params["w_hz"], params["w_hn"]],
                          axis=1).astype(jnp.bfloat16)
    b_i = jnp.concatenate([params["b_ir"], params["b_iz"], params["b_in"]], axis=1)
    b_h = jnp.concatenate([params["b_hr"], params["b_hz"], params["b_hn"]], axis=1)

    gi = jnp.dot(x.astype(jnp.bfloat16).reshape(B * T, E), W_i,
                 preferred_element_type=jnp.float32).reshape(B, T, 3 * H) + b_i

    def step(h, t):
        g = gi[:, t, :]
        gh = jnp.dot(h.astype(jnp.bfloat16), W_h,
                     preferred_element_type=jnp.float32) + b_h
        r = jax.nn.sigmoid(g[:, :H] + gh[:, :H])
        z = jax.nn.sigmoid(g[:, H:2 * H] + gh[:, H:2 * H])
        n = jnp.tanh(g[:, 2 * H:] + r * gh[:, 2 * H:])
        h_new = (1.0 - z) * n + z * h
        mask = (t < ulens)[:, None]
        return jnp.where(mask, h_new, h), None

    h0 = jnp.zeros((B, H), jnp.float32)
    h_final, _ = jax.lax.scan(step, h0, jnp.arange(T))
    return h_final


# ---------------------------------------------------------------------------
# Deterministic parameter initialization (synthetic; no checkpoint loading).
# ---------------------------------------------------------------------------
def init_params(key, vocab_size, emb_size, hidden_size):
    ks = jax.random.split(key, 13)
    s = 1.0 / np.sqrt(hidden_size)
    u = lambda k, shape: jax.random.uniform(k, shape, jnp.float32, -s, s)
    return {
        "embedding": jax.random.normal(ks[0], (vocab_size, emb_size), jnp.float32) * 0.1,
        "w_ir": u(ks[1], (emb_size, hidden_size)),
        "w_iz": u(ks[2], (emb_size, hidden_size)),
        "w_in": u(ks[3], (emb_size, hidden_size)),
        "w_hr": u(ks[4], (hidden_size, hidden_size)),
        "w_hz": u(ks[5], (hidden_size, hidden_size)),
        "w_hn": u(ks[6], (hidden_size, hidden_size)),
        "b_ir": u(ks[7], (1, hidden_size)),
        "b_iz": u(ks[8], (1, hidden_size)),
        "b_in": u(ks[9], (1, hidden_size)),
        "b_hr": u(ks[10], (1, hidden_size)),
        "b_hz": u(ks[11], (1, hidden_size)),
        "b_hn": u(ks[12], (1, hidden_size)),
    }


if __name__ == "__main__":
    # Small deterministic example: batch=4, seq=16, emb=32, hidden=32, vocab=50.
    B, T, E, H, V = 4, 16, 32, 32, 50

    key = jax.random.PRNGKey(0)
    k_par, k_tok = jax.random.split(key)
    params = init_params(k_par, V, E, H)

    utterances = jax.random.randint(k_tok, (B, T), 0, V, dtype=jnp.int32)
    ulens = jnp.array([16, 9, 3, 12], dtype=jnp.int32)   # valid lengths per sequence

    fwd = jax.jit(u_encoder_forward)
    out = jax.block_until_ready(fwd(utterances, ulens, params))

    ref = jax.block_until_ready(u_encoder_reference(utterances, ulens, params))
    np.testing.assert_allclose(np.asarray(out), np.asarray(ref), rtol=1e-2, atol=1e-2)

    assert out.shape == (B, H)
    print("KERNEL_OK")
</pallas_src>

<mosaic_0001>
module attributes {stable_mosaic.version = 11 : i64} {
  func.func @_input_proj_kernel(%arg0: i32, %arg1: memref<128x32xbf16, #tpu.memory_space<vmem>>, %arg2: memref<32x384xbf16, #tpu.memory_space<vmem>>, %arg3: memref<1x384xf32, #tpu.memory_space<vmem>>, %arg4: memref<128x384xf32, #tpu.memory_space<vmem>>) attributes {dimension_semantics = [#tpu.dimension_semantics<parallel>], iteration_bounds = array<i64: 1>, scalar_prefetch = 0 : i64, scratch_operands = 0 : i64, tpu.core_type = #tpu.core_type<tc>, window_params = [{transform_indices = @transform_0, window_bounds = array<i64: 128, 32>}, {pipeline_mode = #tpu.pipeline_mode<synchronous>, transform_indices = @transform_1, window_bounds = array<i64: 32, 384>}, {pipeline_mode = #tpu.pipeline_mode<synchronous>, transform_indices = @transform_2, window_bounds = array<i64: 1, 384>}, {transform_indices = @transform_3, window_bounds = array<i64: 128, 384>}]} {
    %c0 = arith.constant 0 : index
    %c0_0 = arith.constant 0 : index
    %0 = vector.load %arg1[%c0, %c0_0] : memref<128x32xbf16, #tpu.memory_space<vmem>>, vector<128x32xbf16>
    %c0_1 = arith.constant 0 : index
    %c0_2 = arith.constant 0 : index
    %1 = vector.load %arg2[%c0_1, %c0_2] : memref<32x384xbf16, #tpu.memory_space<vmem>>, vector<32x384xbf16>
    %cst = arith.constant dense<0.000000e+00> : vector<128x384xf32>
    %2 = tpu.matmul %0, %1, %cst {dimension_numbers = #tpu.dot_dimension_numbers<[1], [0], [0], [1], [0, 0, 1, 1], [], []>} : vector<128x32xbf16>, vector<32x384xbf16>, vector<128x384xf32> -> vector<128x384xf32>
    %c0_3 = arith.constant 0 : index
    %c0_4 = arith.constant 0 : index
    %3 = vector.load %arg3[%c0_3, %c0_4] : memref<1x384xf32, #tpu.memory_space<vmem>>, vector<1x384xf32>
    %4 = vector.broadcast %3 : vector<1x384xf32> to vector<128x384xf32>
    %5 = arith.addf %2, %4 : vector<128x384xf32>
    %c0_5 = arith.constant 0 : index
    %c0_6 = arith.constant 0 : index
    %6 = vector.load %arg4[%c0_5, %c0_6] : memref<128x384xf32, #tpu.memory_space<vmem>>, vector<128x384xf32>
    tpu.vector_store %arg4[%c0_5, %c0_6], %5 {strides = array<i32>} : memref<128x384xf32, #tpu.memory_space<vmem>>, vector<128x384xf32>,
    return
  }
  func.func @transform_0(%arg0: i32) -> (i32, i32) {
    %c0_i32 = arith.constant 0 : i32
    %c0_i32_0 = arith.constant 0 : i32
    return %arg0, %c0_i32 : i32, i32
  }
  func.func @transform_1(%arg0: i32) -> (i32, i32) {
    %c0_i32 = arith.constant 0 : i32
    %c0_i32_0 = arith.constant 0 : i32
    %c0_i32_1 = arith.constant 0 : i32
    return %c0_i32, %c0_i32_0 : i32, i32
  }
  func.func @transform_2(%arg0: i32) -> (i32, i32) {
    %c0_i32 = arith.constant 0 : i32
    %c0_i32_0 = arith.constant 0 : i32
    %c0_i32_1 = arith.constant 0 : i32
    return %c0_i32, %c0_i32_0 : i32, i32
  }
  func.func @transform_3(%arg0: i32) -> (i32, i32) {
    %c0_i32 = arith.constant 0 : i32
    %c0_i32_0 = arith.constant 0 : i32
    return %arg0, %c0_i32 : i32, i32
  }
}

module attributes {stable_mosaic.version = 11 : i64} {
  func.func @_gru_recurrent_kernel(%arg0: i32, %arg1: i32, %arg2: memref<8x1xi32, #tpu.memory_space<vmem>>, %arg3: memref<8x8x384xf32, #tpu.memory_space<vmem>>, %arg4: memref<128x384xbf16, #tpu.memory_space<vmem>>, %arg5: memref<1x384xf32, #tpu.memory_space<vmem>>, %arg6: memref<8x128xf32, #tpu.memory_space<vmem>>) attributes {dimension_semantics = [#tpu.dimension_semantics<parallel>, #tpu.dimension_semantics<arbitrary>], iteration_bounds = array<i64: 1, 2>, scalar_prefetch = 0 : i64, scratch_operands = 0 : i64, tpu.core_type = #tpu.core_type<tc>, window_params = [{transform_indices = @transform_0, window_bounds = array<i64: 8, 1>}, {transform_indices = @transform_1, window_bounds = array<i64: 8, 8, 384>}, {pipeline_mode = #tpu.pipeline_mode<synchronous>, transform_indices = @transform_2, window_bounds = array<i64: 128, 384>}, {pipeline_mode = #tpu.pipeline_mode<synchronous>, transform_indices = @transform_3, window_bounds = array<i64: 1, 384>}, {transform_indices = @transform_4, window_bounds = array<i64: 8, 128>}]} {
    %c0_i32 = arith.constant 0 : i32
    %0 = arith.cmpi eq, %arg1, %c0_i32 : i32
    %1 = arith.extui %0 : i1 to i32
    %c0_i32_0 = arith.constant 0 : i32
    %2 = arith.cmpi ne, %1, %c0_i32_0 : i32
    scf.if %2 {
      %cst_59 = arith.constant 0.000000e+00 : f32
      %315 = vector.broadcast %cst_59 : f32 to vector<8x128xf32>
      %c0_60 = arith.constant 0 : index
      %c0_61 = arith.constant 0 : index
      %316 = vector.load %arg6[%c0_60, %c0_61] : memref<8x128xf32, #tpu.memory_space<vmem>>, vector<8x128xf32>
      tpu.vector_store %arg6[%c0_60, %c0_61], %315 {strides = array<i32>} : memref<8x128xf32, #tpu.memory_space<vmem>>, vector<8x128xf32>,
    } else {
    }
    %c0 = arith.constant 0 : index
    %c0_1 = arith.constant 0 : index
    %3 = vector.load %arg6[%c0, %c0_1] : memref<8x128xf32, #tpu.memory_space<vmem>>, vector<8x128xf32>
    %c0_2 = arith.constant 0 : index
    %c0_3 = arith.constant 0 : index
    %4 = vector.load %arg4[%c0_2, %c0_3] : memref<128x384xbf16, #tpu.memory_space<vmem>>, vector<128x384xbf16>
    %c0_4 = arith.constant 0 : index
    %c0_5 = arith.constant 0 : index
    %5 = vector.load %arg5[%c0_4, %c0_5] : memref<1x384xf32, #tpu.memory_space<vmem>>, vector<1x384xf32>
    %c0_6 = arith.constant 0 : index
    %c0_7 = arith.constant 0 : index
    %6 = vector.load %arg2[%c0_6, %c0_7] : memref<8x1xi32, #tpu.memory_space<vmem>>, vector<8x1xi32>
    %c8_i32 = arith.constant 8 : i32
    %7 = arith.muli %arg1, %c8_i32 : i32
    %8 = vector.broadcast %7 : i32 to vector<8x1xi32>
    %9 = arith.subi %6, %8 : vector<8x1xi32>
    %c0_i32_8 = arith.constant 0 : i32
    %10 = arith.index_cast %c0_i32_8 : i32 to index
    %c0_9 = arith.constant 0 : index
    %c0_10 = arith.constant 0 : index
    %11 = vector.load %arg3[%10, %c0_9, %c0_10] : memref<8x8x384xf32, #tpu.memory_space<vmem>>, vector<1x8x384xf32>
    %12 = vector.shape_cast %11 : vector<1x8x384xf32> to vector<8x384xf32>
    %13 = arith.truncf %3 : vector<8x128xf32> to vector<8x128xbf16>
    %cst = arith.constant dense<0.000000e+00> : vector<8x384xf32>
    %14 = tpu.matmul %13, %4, %cst {dimension_numbers = #tpu.dot_dimension_numbers<[1], [0], [0], [1], [0, 0, 1, 1], [], []>} : vector<8x128xbf16>, vector<128x384xbf16>, vector<8x384xf32> -> vector<8x384xf32>
    %15 = vector.broadcast %5 : vector<1x384xf32> to vector<8x384xf32>
    %16 = arith.addf %14, %15 : vector<8x384xf32>
    %17 = vector.extract_strided_slice %12 {offsets = [0, 0], sizes = [8, 128], strides = [1, 1]} : vector<8x384xf32> to vector<8x128xf32>
    %18 = vector.extract_strided_slice %16 {offsets = [0, 0], sizes = [8, 128], strides = [1, 1]} : vector<8x384xf32> to vector<8x128xf32>
    %19 = arith.addf %17, %18 : vector<8x128xf32>
    %20 = arith.negf %19 : vector<8x128xf32>
    %21 = math.exp %20 : vector<8x128xf32>
    %cst_11 = arith.constant 1.000000e+00 : f32
    %22 = vector.broadcast %cst_11 : f32 to vector<8x128xf32>
    %23 = arith.addf %22, %21 : vector<8x128xf32>
    %24 = arith.divf %22, %23 : vector<8x128xf32>
    %25 = vector.extract_strided_slice %12 {offsets = [0, 128], sizes = [8, 128], strides = [1, 1]} : vector<8x384xf32> to vector<8x128xf32>
    %26 = vector.extract_strided_slice %16 {offsets = [0, 128], sizes = [8, 128], strides = [1, 1]} : vector<8x384xf32> to vector<8x128xf32>
    %27 = arith.addf %25, %26 : vector<8x128xf32>
    %28 = arith.negf %27 : vector<8x128xf32>
    %29 = math.exp %28 : vector<8x128xf32>
    %cst_12 = arith.constant 1.000000e+00 : f32
    %30 = vector.broadcast %cst_12 : f32 to vector<8x128xf32>
    %31 = arith.addf %30, %29 : vector<8x128xf32>
    %32 = arith.divf %30, %31 : vector<8x128xf32>
    %33 = vector.extract_strided_slice %12 {offsets = [0, 256], sizes = [8, 128], strides = [1, 1]} : vector<8x384xf32> to vector<8x128xf32>
    %34 = vector.extract_strided_slice %16 {offsets = [0, 256], sizes = [8, 128], strides = [1, 1]} : vector<8x384xf32> to vector<8x128xf32>
    %35 = arith.mulf %24, %34 : vector<8x128xf32>
    %36 = arith.addf %33, %35 : vector<8x128xf32>
    %37 = math.tanh %36 : vector<8x128xf32>
    %cst_13 = arith.constant 1.000000e+00 : f32
    %38 = vector.broadcast %cst_13 : f32 to vector<8x128xf32>
    %39 = arith.subf %38, %32 : vector<8x128xf32>
    %40 = arith.mulf %39, %37 : vector<8x128xf32>
    %41 = arith.mulf %32, %3 : vector<8x128xf32>
    %42 = arith.addf %40, %41 : vector<8x128xf32>
    %43 = vector.broadcast %c0_i32_8 : i32 to vector<8x1xi32>
    %44 = arith.cmpi slt, %43, %9 : vector<8x1xi32>
    %45 = vector.shape_cast %44 : vector<8x1xi1> to vector<8x1xi1>
    %46 = vector.broadcast %45 : vector<8x1xi1> to vector<8x128xi1>
    %47 = arith.select %46, %42, %3 : vector<8x128xi1>, vector<8x128xf32>
    %c1_i32 = arith.constant 1 : i32
    %48 = arith.index_cast %c1_i32 : i32 to index
    %c0_14 = arith.constant 0 : index
    %c0_15 = arith.constant 0 : index
    %49 = vector.load %arg3[%48, %c0_14, %c0_15] : memref<8x8x384xf32, #tpu.memory_space<vmem>>, vector<1x8x384xf32>
    %50 = vector.shape_cast %49 : vector<1x8x384xf32> to vector<8x384xf32>
    %51 = arith.truncf %47 : vector<8x128xf32> to vector<8x128xbf16>
    %cst_16 = arith.constant dense<0.000000e+00> : vector<8x384xf32>
    %52 = tpu.matmul %51, %4, %cst_16 {dimension_numbers = #tpu.dot_dimension_numbers<[1], [0], [0], [1], [0, 0, 1, 1], [], []>} : vector<8x128xbf16>, vector<128x384xbf16>, vector<8x384xf32> -> vector<8x384xf32>
    %53 = vector.broadcast %5 : vector<1x384xf32> to vector<8x384xf32>
    %54 = arith.addf %52, %53 : vector<8x384xf32>
    %55 = vector.extract_strided_slice %50 {offsets = [0, 0], sizes = [8, 128], strides = [1, 1]} : vector<8x384xf32> to vector<8x128xf32>
    %56 = vector.extract_strided_slice %54 {offsets = [0, 0], sizes = [8, 128], strides = [1, 1]} : vector<8x384xf32> to vector<8x128xf32>
    %57 = arith.addf %55, %56 : vector<8x128xf32>
    %58 = arith.negf %57 : vector<8x128xf32>
    %59 = math.exp %58 : vector<8x128xf32>
    %cst_17 = arith.constant 1.000000e+00 : f32
    %60 = vector.broadcast %cst_17 : f32 to vector<8x128xf32>
    %61 = arith.addf %60, %59 : vector<8x128xf32>
    %62 = arith.divf %60, %61 : vector<8x128xf32>
    %63 = vector.extract_strided_slice %50 {offsets = [0, 128], sizes = [8, 128], strides = [1, 1]} : vector<8x384xf32> to vector<8x128xf32>
    %64 = vector.extract_strided_slice %54 {offsets = [0, 128], sizes = [8, 128], strides = [1, 1]} : vector<8x384xf32> to vector<8x128xf32>
    %65 = arith.addf %63, %64 : vector<8x128xf32>
    %66 = arith.negf %65 : vector<8x128xf32>
    %67 = math.exp %66 : vector<8x128xf32>
    %cst_18 = arith.constant 1.000000e+00 : f32
    %68 = vector.broadcast %cst_18 : f32 to vector<8x128xf32>
    %69 = arith.addf %68, %67 : vector<8x128xf32>
    %70 = arith.divf %68, %69 : vector<8x128xf32>
    %71 = vector.extract_strided_slice %50 {offsets = [0, 256], sizes = [8, 128], strides = [1, 1]} : vector<8x384xf32> to vector<8x128xf32>
    %72 = vector.extract_strided_slice %54 {offsets = [0, 256], sizes = [8, 128], strides = [1, 1]} : vector<8x384xf32> to vector<8x128xf32>
    %73 = arith.mulf %62, %72 : vector<8x128xf32>
    %74 = arith.addf %71, %73 : vector<8x128xf32>
    %75 = math.tanh %74 : vector<8x128xf32>
    %cst_19 = arith.constant 1.000000e+00 : f32
    %76 = vector.broadcast %cst_19 : f32 to vector<8x128xf32>
    %77 = arith.subf %76, %70 : vector<8x128xf32>
    %78 = arith.mulf %77, %75 : vector<8x128xf32>
    %79 = arith.mulf %70, %47 : vector<8x128xf32>
    %80 = arith.addf %78, %79 : vector<8x128xf32>
    %81 = vector.broadcast %c1_i32 : i32 to vector<8x1xi32>
    %82 = arith.cmpi slt, %81, %9 : vector<8x1xi32>
    %83 = vector.shape_cast %82 : vector<8x1xi1> to vector<8x1xi1>
    %84 = vector.broadcast %83 : vector<8x1xi1> to vector<8x128xi1>
    %85 = arith.select %84, %80, %47 : vector<8x128xi1>, vector<8x128xf32>
    %c2_i32 = arith.constant 2 : i32
    %86 = arith.index_cast %c2_i32 : i32 to index
    %c0_20 = arith.constant 0 : index
    %c0_21 = arith.constant 0 : index
    %87 = vector.load %arg3[%86, %c0_20, %c0_21] : memref<8x8x384xf32, #tpu.memory_space<vmem>>, vector<1x8x384xf32>
    %88 = vector.shape_cast %87 : vector<1x8x384xf32> to vector<8x384xf32>
    %89 = arith.truncf %85 : vector<8x128xf32> to vector<8x128xbf16>
    %cst_22 = arith.constant dense<0.000000e+00> : vector<8x384xf32>
    %90 = tpu.matmul %89, %4, %cst_22 {dimension_numbers = #tpu.dot_dimension_numbers<[1], [0], [0], [1], [0, 0, 1, 1], [], []>} : vector<8x128xbf16>, vector<128x384xbf16>, vector<8x384xf32> -> vector<8x384xf32>
    %91 = vector.broadcast %5 : vector<1x384xf32> to vector<8x384xf32>
    %92 = arith.addf %90, %91 : vector<8x384xf32>
    %93 = vector.extract_strided_slice %88 {offsets = [0, 0], sizes = [8, 128], strides = [1, 1]} : vector<8x384xf32> to vector<8x128xf32>
    %94 = vector.extract_strided_slice %92 {offsets = [0, 0], sizes = [8, 128], strides = [1, 1]} : vector<8x384xf32> to vector<8x128xf32>
    %95 = arith.addf %93, %94 : vector<8x128xf32>
    %96 = arith.negf %95 : vector<8x128xf32>
    %97 = math.exp %96 : vector<8x128xf32>
    %cst_23 = arith.constant 1.000000e+00 : f32
    %98 = vector.broadcast %cst_23 : f32 to vector<8x128xf32>
    %99 = arith.addf %98, %97 : vector<8x128xf32>
    %100 = arith.divf %98, %99 : vector<8x128xf32>
    %101 = vector.extract_strided_slice %88 {offsets = [0, 128], sizes = [8, 128], strides = [1, 1]} : vector<8x384xf32> to vector<8x128xf32>
    %102 = vector.extract_strided_slice %92 {offsets = [0, 128], sizes = [8, 128], strides = [1, 1]} : vector<8x384xf32> to vector<8x128xf32>
    %103 = arith.addf %101, %102 : vector<8x128xf32>
    %104 = arith.negf %103 : vector<8x128xf32>
    %105 = math.exp %104 : vector<8x128xf32>
    %cst_24 = arith.constant 1.000000e+00 : f32
    %106 = vector.broadcast %cst_24 : f32 to vector<8x128xf32>
    %107 = arith.addf %106, %105 : vector<8x128xf32>
    %108 = arith.divf %106, %107 : vector<8x128xf32>
    %109 = vector.extract_strided_slice %88 {offsets = [0, 256], sizes = [8, 128], strides = [1, 1]} : vector<8x384xf32> to vector<8x128xf32>
    %110 = vector.extract_strided_slice %92 {offsets = [0, 256], sizes = [8, 128], strides = [1, 1]} : vector<8x384xf32> to vector<8x128xf32>
    %111 = arith.mulf %100, %110 : vector<8x128xf32>
    %112 = arith.addf %109, %111 : vector<8x128xf32>
    %113 = math.tanh %112 : vector<8x128xf32>
    %cst_25 = arith.constant 1.000000e+00 : f32
    %114 = vector.broadcast %cst_25 : f32 to vector<8x128xf32>
    %115 = arith.subf %114, %108 : vector<8x128xf32>
    %116 = arith.mulf %115, %113 : vector<8x128xf32>
    %117 = arith.mulf %108, %85 : vector<8x128xf32>
    %118 = arith.addf %116, %117 : vector<8x128xf32>
    %119 = vector.broadcast %c2_i32 : i32 to vector<8x1xi32>
    %120 = arith.cmpi slt, %119, %9 : vector<8x1xi32>
    %121 = vector.shape_cast %120 : vector<8x1xi1> to vector<8x1xi1>
    %122 = vector.broadcast %121 : vector<8x1xi1> to vector<8x128xi1>
    %123 = arith.select %122, %118, %85 : vector<8x128xi1>, vector<8x128xf32>
    %c3_i32 = arith.constant 3 : i32
    %124 = arith.index_cast %c3_i32 : i32 to index
    %c0_26 = arith.constant 0 : index
    %c0_27 = arith.constant 0 : index
    %125 = vector.load %arg3[%124, %c0_26, %c0_27] : memref<8x8x384xf32, #tpu.memory_space<vmem>>, vector<1x8x384xf32>
    %126 = vector.shape_cast %125 : vector<1x8x384xf32> to vector<8x384xf32>
    %127 = arith.truncf %123 : vector<8x128xf32> to vector<8x128xbf16>
    %cst_28 = arith.constant dense<0.000000e+00> : vector<8x384xf32>
    %128 = tpu.matmul %127, %4, %cst_28 {dimension_numbers = #tpu.dot_dimension_numbers<[1], [0], [0], [1], [0, 0, 1, 1], [], []>} : vector<8x128xbf16>, vector<128x384xbf16>, vector<8x384xf32> -> vector<8x384xf32>
    %129 = vector.broadcast %5 : vector<1x384xf32> to vector<8x384xf32>
    %130 = arith.addf %128, %129 : vector<8x384xf32>
    %131 = vector.extract_strided_slice %126 {offsets = [0, 0], sizes = [8, 128], strides = [1, 1]} : vector<8x384xf32> to vector<8x128xf32>
    %132 = vector.extract_strided_slice %130 {offsets = [0, 0], sizes = [8, 128], strides = [1, 1]} : vector<8x384xf32> to vector<8x128xf32>
    %133 = arith.addf %131, %132 : vector<8x128xf32>
    %134 = arith.negf %133 : vector<8x128xf32>
    %135 = math.exp %134 : vector<8x128xf32>
    %cst_29 = arith.constant 1.000000e+00 : f32
    %136 = vector.broadcast %cst_29 : f32 to vector<8x128xf32>
    %137 = arith.addf %136, %135 : vector<8x128xf32>
    %138 = arith.divf %136, %137 : vector<8x128xf32>
    %139 = vector.extract_strided_slice %126 {offsets = [0, 128], sizes = [8, 128], strides = [1, 1]} : vector<8x384xf32> to vector<8x128xf32>
    %140 = vector.extract_strided_slice %130 {offsets = [0, 128], sizes = [8, 128], strides = [1, 1]} : vector<8x384xf32> to vector<8x128xf32>
    %141 = arith.addf %139, %140 : vector<8x128xf32>
    %142 = arith.negf %141 : vector<8x128xf32>
    %143 = math.exp %142 : vector<8x128xf32>
    %cst_30 = arith.constant 1.000000e+00 : f32
    %144 = vector.broadcast %cst_30 : f32 to vector<8x128xf32>
    %145 = arith.addf %144, %143 : vector<8x128xf32>
    %146 = arith.divf %144, %145 : vector<8x128xf32>
    %147 = vector.extract_strided_slice %126 {offsets = [0, 256], sizes = [8, 128], strides = [1, 1]} : vector<8x384xf32> to vector<8x128xf32>
    %148 = vector.extract_strided_slice %130 {offsets = [0, 256], sizes = [8, 128], strides = [1, 1]} : vector<8x384xf32> to vector<8x128xf32>
    %149 = arith.mulf %138, %148 : vector<8x128xf32>
    %150 = arith.addf %147, %149 : vector<8x128xf32>
    %151 = math.tanh %150 : vector<8x128xf32>
    %cst_31 = arith.constant 1.000000e+00 : f32
    %152 = vector.broadcast %cst_31 : f32 to vector<8x128xf32>
    %153 = arith.subf %152, %146 : vector<8x128xf32>
    %154 = arith.mulf %153, %151 : vector<8x128xf32>
    %155 = arith.mulf %146, %123 : vector<8x128xf32>
    %156 = arith.addf %154, %155 : vector<8x128xf32>
    %157 = vector.broadcast %c3_i32 : i32 to vector<8x1xi32>
    %158 = arith.cmpi slt, %157, %9 : vector<8x1xi32>
    %159 = vector.shape_cast %158 : vector<8x1xi1> to vector<8x1xi1>
    %160 = vector.broadcast %159 : vector<8x1xi1> to vector<8x128xi1>
    %161 = arith.select %160, %156, %123 : vector<8x128xi1>, vector<8x128xf32>
    %c4_i32 = arith.constant 4 : i32
    %162 = arith.index_cast %c4_i32 : i32 to index
    %c0_32 = arith.constant 0 : index
    %c0_33 = arith.constant 0 : index
    %163 = vector.load %arg3[%162, %c0_32, %c0_33] : memref<8x8x384xf32, #tpu.memory_space<vmem>>, vector<1x8x384xf32>
    %164 = vector.shape_cast %163 : vector<1x8x384xf32> to vector<8x384xf32>
    %165 = arith.truncf %161 : vector<8x128xf32> to vector<8x128xbf16>
    %cst_34 = arith.constant dense<0.000000e+00> : vector<8x384xf32>
    %166 = tpu.matmul %165, %4, %cst_34 {dimension_numbers = #tpu.dot_dimension_numbers<[1], [0], [0], [1], [0, 0, 1, 1], [], []>} : vector<8x128xbf16>, vector<128x384xbf16>, vector<8x384xf32> -> vector<8x384xf32>
    %167 = vector.broadcast %5 : vector<1x384xf32> to vector<8x384xf32>
    %168 = arith.addf %166, %167 : vector<8x384xf32>
    %169 = vector.extract_strided_slice %164 {offsets = [0, 0], sizes = [8, 128], strides = [1, 1]} : vector<8x384xf32> to vector<8x128xf32>
    %170 = vector.extract_strided_slice %168 {offsets = [0, 0], sizes = [8, 128], strides = [1, 1]} : vector<8x384xf32> to vector<8x128xf32>
    %171 = arith.addf %169, %170 : vector<8x128xf32>
    %172 = arith.negf %171 : vector<8x128xf32>
    %173 = math.exp %172 : vector<8x128xf32>
    %cst_35 = arith.constant 1.000000e+00 : f32
    %174 = vector.broadcast %cst_35 : f32 to vector<8x128xf32>
    %175 = arith.addf %174, %173 : vector<8x128xf32>
    %176 = arith.divf %174, %175 : vector<8x128xf32>
    %177 = vector.extract_strided_slice %164 {offsets = [0, 128], sizes = [8, 128], strides = [1, 1]} : vector<8x384xf32> to vector<8x128xf32>
    %178 = vector.extract_strided_slice %168 {offsets = [0, 128], sizes = [8, 128], strides = [1, 1]} : vector<8x384xf32> to vector<8x128xf32>
    %179 = arith.addf %177, %178 : vector<8x128xf32>
    %180 = arith.negf %179 : vector<8x128xf32>
    %181 = math.exp %180 : vector<8x128xf32>
    %cst_36 = arith.constant 1.000000e+00 : f32
    %182 = vector.broadcast %cst_36 : f32 to vector<8x128xf32>
    %183 = arith.addf %182, %181 : vector<8x128xf32>
    %184 = arith.divf %182, %183 : vector<8x128xf32>
    %185 = vector.extract_strided_slice %164 {offsets = [0, 256], sizes = [8, 128], strides = [1, 1]} : vector<8x384xf32> to vector<8x128xf32>
    %186 = vector.extract_strided_slice %168 {offsets = [0, 256], sizes = [8, 128], strides = [1, 1]} : vector<8x384xf32> to vector<8x128xf32>
    %187 = arith.mulf %176, %186 : vector<8x128xf32>
    %188 = arith.addf %185, %187 : vector<8x128xf32>
    %189 = math.tanh %188 : vector<8x128xf32>
    %cst_37 = arith.constant 1.000000e+00 : f32
    %190 = vector.broadcast %cst_37 : f32 to vector<8x128xf32>
    %191 = arith.subf %190, %184 : vector<8x128xf32>
    %192 = arith.mulf %191, %189 : vector<8x128xf32>
    %193 = arith.mulf %184, %161 : vector<8x128xf32>
    %194 = arith.addf %192, %193 : vector<8x128xf32>
    %195 = vector.broadcast %c4_i32 : i32 to vector<8x1xi32>
    %196 = arith.cmpi slt, %195, %9 : vector<8x1xi32>
    %197 = vector.shape_cast %196 : vector<8x1xi1> to vector<8x1xi1>
    %198 = vector.broadcast %197 : vector<8x1xi1> to vector<8x128xi1>
    %199 = arith.select %198, %194, %161 : vector<8x128xi1>, vector<8x128xf32>
    %c5_i32 = arith.constant 5 : i32
    %200 = arith.index_cast %c5_i32 : i32 to index
    %c0_38 = arith.constant 0 : index
    %c0_39 = arith.constant 0 : index
    %201 = vector.load %arg3[%200, %c0_38, %c0_39] : memref<8x8x384xf32, #tpu.memory_space<vmem>>, vector<1x8x384xf32>
    %202 = vector.shape_cast %201 : vector<1x8x384xf32> to vector<8x384xf32>
    %203 = arith.truncf %199 : vector<8x128xf32> to vector<8x128xbf16>
    %cst_40 = arith.constant dense<0.000000e+00> : vector<8x384xf32>
    %204 = tpu.matmul %203, %4, %cst_40 {dimension_numbers = #tpu.dot_dimension_numbers<[1], [0], [0], [1], [0, 0, 1, 1], [], []>} : vector<8x128xbf16>, vector<128x384xbf16>, vector<8x384xf32> -> vector<8x384xf32>
    %205 = vector.broadcast %5 : vector<1x384xf32> to vector<8x384xf32>
    %206 = arith.addf %204, %205 : vector<8x384xf32>
    %207 = vector.extract_strided_slice %202 {offsets = [0, 0], sizes = [8, 128], strides = [1, 1]} : vector<8x384xf32> to vector<8x128xf32>
    %208 = vector.extract_strided_slice %206 {offsets = [0, 0], sizes = [8, 128], strides = [1, 1]} : vector<8x384xf32> to vector<8x128xf32>
    %209 = arith.addf %207, %208 : vector<8x128xf32>
    %210 = arith.negf %209 : vector<8x128xf32>
    %211 = math.exp %210 : vector<8x128xf32>
    %cst_41 = arith.constant 1.000000e+00 : f32
    %212 = vector.broadcast %cst_41 : f32 to vector<8x128xf32>
    %213 = arith.addf %212, %211 : vector<8x128xf32>
    %214 = arith.divf %212, %213 : vector<8x128xf32>
    %215 = vector.extract_strided_slice %202 {offsets = [0, 128], sizes = [8, 128], strides = [1, 1]} : vector<8x384xf32> to vector<8x128xf32>
    %216 = vector.extract_strided_slice %206 {offsets = [0, 128], sizes = [8, 128], strides = [1, 1]} : vector<8x384xf32> to vector<8x128xf32>
    %217 = arith.addf %215, %216 : vector<8x128xf32>
    %218 = arith.negf %217 : vector<8x128xf32>
    %219 = math.exp %218 : vector<8x128xf32>
    %cst_42 = arith.constant 1.000000e+00 : f32
    %220 = vector.broadcast %cst_42 : f32 to vector<8x128xf32>
    %221 = arith.addf %220, %219 : vector<8x128xf32>
    %222 = arith.divf %220, %221 : vector<8x128xf32>
    %223 = vector.extract_strided_slice %202 {offsets = [0, 256], sizes = [8, 128], strides = [1, 1]} : vector<8x384xf32> to vector<8x128xf32>
    %224 = vector.extract_strided_slice %206 {offsets = [0, 256], sizes = [8, 128], strides = [1, 1]} : vector<8x384xf32> to vector<8x128xf32>
    %225 = arith.mulf %214, %224 : vector<8x128xf32>
    %226 = arith.addf %223, %225 : vector<8x128xf32>
    %227 = math.tanh %226 : vector<8x128xf32>
    %cst_43 = arith.constant 1.000000e+00 : f32
    %228 = vector.broadcast %cst_43 : f32 to vector<8x128xf32>
    %229 = arith.subf %228, %222 : vector<8x128xf32>
    %230 = arith.mulf %229, %227 : vector<8x128xf32>
    %231 = arith.mulf %222, %199 : vector<8x128xf32>
    %232 = arith.addf %230, %231 : vector<8x128xf32>
    %233 = vector.broadcast %c5_i32 : i32 to vector<8x1xi32>
    %234 = arith.cmpi slt, %233, %9 : vector<8x1xi32>
    %235 = vector.shape_cast %234 : vector<8x1xi1> to vector<8x1xi1>
    %236 = vector.broadcast %235 : vector<8x1xi1> to vector<8x128xi1>
    %237 = arith.select %236, %232, %199 : vector<8x128xi1>, vector<8x128xf32>
    %c6_i32 = arith.constant 6 : i32
    %238 = arith.index_cast %c6_i32 : i32 to index
    %c0_44 = arith.constant 0 : index
    %c0_45 = arith.constant 0 : index
    %239 = vector.load %arg3[%238, %c0_44, %c0_45] : memref<8x8x384xf32, #tpu.memory_space<vmem>>, vector<1x8x384xf32>
    %240 = vector.shape_cast %239 : vector<1x8x384xf32> to vector<8x384xf32>
    %241 = arith.truncf %237 : vector<8x128xf32> to vector<8x128xbf16>
    %cst_46 = arith.constant dense<0.000000e+00> : vector<8x384xf32>
    %242 = tpu.matmul %241, %4, %cst_46 {dimension_numbers = #tpu.dot_dimension_numbers<[1], [0], [0], [1], [0, 0, 1, 1], [], []>} : vector<8x128xbf16>, vector<128x384xbf16>, vector<8x384xf32> -> vector<8x384xf32>
    %243 = vector.broadcast %5 : vector<1x384xf32> to vector<8x384xf32>
    %244 = arith.addf %242, %243 : vector<8x384xf32>
    %245 = vector.extract_strided_slice %240 {offsets = [0, 0], sizes = [8, 128], strides = [1, 1]} : vector<8x384xf32> to vector<8x128xf32>
    %246 = vector.extract_strided_slice %244 {offsets = [0, 0], sizes = [8, 128], strides = [1, 1]} : vector<8x384xf32> to vector<8x128xf32>
    %247 = arith.addf %245, %246 : vector<8x128xf32>
    %248 = arith.negf %247 : vector<8x128xf32>
    %249 = math.exp %248 : vector<8x128xf32>
    %cst_47 = arith.constant 1.000000e+00 : f32
    %250 = vector.broadcast %cst_47 : f32 to vector<8x128xf32>
    %251 = arith.addf %250, %249 : vector<8x128xf32>
    %252 = arith.divf %250, %251 : vector<8x128xf32>
    %253 = vector.extract_strided_slice %240 {offsets = [0, 128], sizes = [8, 128], strides = [1, 1]} : vector<8x384xf32> to vector<8x128xf32>
    %254 = vector.extract_strided_slice %244 {offsets = [0, 128], sizes = [8, 128], strides = [1, 1]} : vector<8x384xf32> to vector<8x128xf32>
    %255 = arith.addf %253, %254 : vector<8x128xf32>
    %256 = arith.negf %255 : vector<8x128xf32>
    %257 = math.exp %256 : vector<8x128xf32>
    %cst_48 = arith.constant 1.000000e+00 : f32
    %258 = vector.broadcast %cst_48 : f32 to vector<8x128xf32>
    %259 = arith.addf %258, %257 : vector<8x128xf32>
    %260 = arith.divf %258, %259 : vector<8x128xf32>
    %261 = vector.extract_strided_slice %240 {offsets = [0, 256], sizes = [8, 128], strides = [1, 1]} : vector<8x384xf32> to vector<8x128xf32>
    %262 = vector.extract_strided_slice %244 {offsets = [0, 256], sizes = [8, 128], strides = [1, 1]} : vector<8x384xf32> to vector<8x128xf32>
    %263 = arith.mulf %252, %262 : vector<8x128xf32>
    %264 = arith.addf %261, %263 : vector<8x128xf32>
    %265 = math.tanh %264 : vector<8x128xf32>
    %cst_49 = arith.constant 1.000000e+00 : f32
    %266 = vector.broadcast %cst_49 : f32 to vector<8x128xf32>
    %267 = arith.subf %266, %260 : vector<8x128xf32>
    %268 = arith.mulf %267, %265 : vector<8x128xf32>
    %269 = arith.mulf %260, %237 : vector<8x128xf32>
    %270 = arith.addf %268, %269 : vector<8x128xf32>
    %271 = vector.broadcast %c6_i32 : i32 to vector<8x1xi32>
    %272 = arith.cmpi slt, %271, %9 : vector<8x1xi32>
    %273 = vector.shape_cast %272 : vector<8x1xi1> to vector<8x1xi1>
    %274 = vector.broadcast %273 : vector<8x1xi1> to vector<8x128xi1>
    %275 = arith.select %274, %270, %237 : vector<8x128xi1>, vector<8x128xf32>
    %c7_i32 = arith.constant 7 : i32
    %276 = arith.index_cast %c7_i32 : i32 to index
    %c0_50 = arith.constant 0 : index
    %c0_51 = arith.constant 0 : index
    %277 = vector.load %arg3[%276, %c0_50, %c0_51] : memref<8x8x384xf32, #tpu.memory_space<vmem>>, vector<1x8x384xf32>
    %278 = vector.shape_cast %277 : vector<1x8x384xf32> to vector<8x384xf32>
    %279 = arith.truncf %275 : vector<8x128xf32> to vector<8x128xbf16>
    %cst_52 = arith.constant dense<0.000000e+00> : vector<8x384xf32>
    %280 = tpu.matmul %279, %4, %cst_52 {dimension_numbers = #tpu.dot_dimension_numbers<[1], [0], [0], [1], [0, 0, 1, 1], [], []>} : vector<8x128xbf16>, vector<128x384xbf16>, vector<8x384xf32> -> vector<8x384xf32>
    %281 = vector.broadcast %5 : vector<1x384xf32> to vector<8x384xf32>
    %282 = arith.addf %280, %281 : vector<8x384xf32>
    %283 = vector.extract_strided_slice %278 {offsets = [0, 0], sizes = [8, 128], strides = [1, 1]} : vector<8x384xf32> to vector<8x128xf32>
    %284 = vector.extract_strided_slice %282 {offsets = [0, 0], sizes = [8, 128], strides = [1, 1]} : vector<8x384xf32> to vector<8x128xf32>
    %285 = arith.addf %283, %284 : vector<8x128xf32>
    %286 = arith.negf %285 : vector<8x128xf32>
    %287 = math.exp %286 : vector<8x128xf32>
    %cst_53 = arith.constant 1.000000e+00 : f32
    %288 = vector.broadcast %cst_53 : f32 to vector<8x128xf32>
    %289 = arith.addf %288, %287 : vector<8x128xf32>
    %290 = arith.divf %288, %289 : vector<8x128xf32>
    %291 = vector.extract_strided_slice %278 {offsets = [0, 128], sizes = [8, 128], strides = [1, 1]} : vector<8x384xf32> to vector<8x128xf32>
    %292 = vector.extract_strided_slice %282 {offsets = [0, 128], sizes = [8, 128], strides = [1, 1]} : vector<8x384xf32> to vector<8x128xf32>
    %293 = arith.addf %291, %292 : vector<8x128xf32>
    %294 = arith.negf %293 : vector<8x128xf32>
    %295 = math.exp %294 : vector<8x128xf32>
    %cst_54 = arith.constant 1.000000e+00 : f32
    %296 = vector.broadcast %cst_54 : f32 to vector<8x128xf32>
    %297 = arith.addf %296, %295 : vector<8x128xf32>
    %298 = arith.divf %296, %297 : vector<8x128xf32>
    %299 = vector.extract_strided_slice %278 {offsets = [0, 256], sizes = [8, 128], strides = [1, 1]} : vector<8x384xf32> to vector<8x128xf32>
    %300 = vector.extract_strided_slice %282 {offsets = [0, 256], sizes = [8, 128], strides = [1, 1]} : vector<8x384xf32> to vector<8x128xf32>
    %301 = arith.mulf %290, %300 : vector<8x128xf32>
    %302 = arith.addf %299, %301 : vector<8x128xf32>
    %303 = math.tanh %302 : vector<8x128xf32>
    %cst_55 = arith.constant 1.000000e+00 : f32
    %304 = vector.broadcast %cst_55 : f32 to vector<8x128xf32>
    %305 = arith.subf %304, %298 : vector<8x128xf32>
    %306 = arith.mulf %305, %303 : vector<8x128xf32>
    %307 = arith.mulf %298, %275 : vector<8x128xf32>
    %308 = arith.addf %306, %307 : vector<8x128xf32>
    %309 = vector.broadcast %c7_i32 : i32 to vector<8x1xi32>
    %310 = arith.cmpi slt, %309, %9 : vector<8x1xi32>
    %311 = vector.shape_cast %310 : vector<8x1xi1> to vector<8x1xi1>
    %312 = vector.broadcast %311 : vector<8x1xi1> to vector<8x128xi1>
    %313 = arith.select %312, %308, %275 : vector<8x128xi1>, vector<8x128xf32>
    %c8_i32_56 = arith.constant 8 : i32
    %c0_57 = arith.constant 0 : index
    %c0_58 = arith.constant 0 : index
    %314 = vector.load %arg6[%c0_57, %c0_58] : memref<8x128xf32, #tpu.memory_space<vmem>>, vector<8x128xf32>
    tpu.vector_store %arg6[%c0_57, %c0_58], %313 {strides = array<i32>} : memref<8x128xf32, #tpu.memory_space<vmem>>, vector<8x128xf32>,
    return
  }
  func.func @transform_0(%arg0: i32, %arg1: i32) -> (i32, i32) {
    %c0_i32 = arith.constant 0 : i32
    %c0_i32_0 = arith.constant 0 : i32
    return %arg0, %c0_i32 : i32, i32
  }
  func.func @transform_1(%arg0: i32, %arg1: i32) -> (i32, i32, i32) {
    %c0_i32 = arith.constant 0 : i32
    %c0_i32_0 = arith.constant 0 : i32
    return %arg1, %arg0, %c0_i32 : i32, i32, i32
  }
  func.func @transform_2(%arg0: i32, %arg1: i32) -> (i32, i32) {
    %c0_i32 = arith.constant 0 : i32
    %c0_i32_0 = arith.constant 0 : i32
    %c0_i32_1 = arith.constant 0 : i32
    return %c0_i32, %c0_i32_0 : i32, i32
  }
  func.func @transform_3(%arg0: i32, %arg1: i32) -> (i32, i32) {
    %c0_i32 = arith.constant 0 : i32
    %c0_i32_0 = arith.constant 0 : i32
    %c0_i32_1 = arith.constant 0 : i32
    return %c0_i32, %c0_i32_0 : i32, i32
  }
  func.func @transform_4(%arg0: i32, %arg1: i32) -> (i32, i32) {
    %c0_i32 = arith.constant 0 : i32
    %c0_i32_0 = arith.constant 0 : i32
    return %arg0, %c0_i32 : i32, i32
  }
}

</mosaic_0001>

<bundles_post_ra>
// kernel: u_encoder_forward.2
= control target key start
LH: loop header
LB: loop body
LE: loop exit
PB: predicated region body
PF: predicated region fallthrough
CT: control target
= control target key end

     0   :  { %vm119_vm0 = vcmask 261120   ;;  %s748_s1 = inlined_call_operand.vmem [shape: bf16[32,384], index: 1, kind: input, shape index: {}]   ;;  %s749_s0 = inlined_call_operand.vmem [shape: bf16[128,32], index: 0, kind: input, shape index: {}]   ;;  %s750_s2 = inlined_call_operand.vmem [shape: f32[1,384], index: 2, kind: input, shape index: {}]   ;;  %s751_s3 = inlined_call_operand.vmem [shape: f32[128,384], index: 3, kind: output, shape index: {}]  }
   0x1   :  { %v389_v0 = vld [vmem:[%s748_s1 + $0x18] sm:$0xf]  ;;  %v435_v1 = vld [vmem:[%s748_s1 + $0x20] sm:$0xf0]  ;;  %v434_v2 = vld [vmem:[%s748_s1 + $0x1c] sm:$0xf] }
   0x2   :  { %v390_v3 = vor.u32 %v435_v1, %v389_v0  ;;  %v391_v4 = vld [vmem:[%s748_s1 + $0x24] sm:$0xf0]  ;;  %v397_v5 = vld [vmem:[%s748_s1 + $0x20] sm:$0xf]  ;;  %v436_v6 = vld [vmem:[%s748_s1 + $0x28] sm:$0xf0] }
   0x3   :  { %v394_v7 = vor.u32 %v434_v2, %v391_v4  ;;  %v398_v8 = vor.u32 %v436_v6, %v397_v5  ;;  %v377_v9 = vld [vmem:[%s748_s1] sm:$0xf]  ;;  %v432_v10 = vld [vmem:[%s748_s1 + $0x8] sm:$0xf0]  ;;  %v431_v11 = vld [vmem:[%s748_s1 + $0x4] sm:$0xf] }
   0x4   :  { %150 = vmatpush.bf16.msra.mxu0 %v390_v3  ;;  %437 = vmatpush.bf16.msra.mxu3 %v390_v3  ;;  %v378_v12 = vor.u32 %v432_v10, %v377_v9  ;;  %v379_v13 = vld [vmem:[%s748_s1 + $0xc] sm:$0xf0]  ;;  %v385_v14 = vld [vmem:[%s748_s1 + $0x8] sm:$0xf]  ;;  %v433_v15 = vld [vmem:[%s748_s1 + $0x10] sm:$0xf0] }
   0x5   :  { %199 = vmatpush.bf16.msra.mxu1 %v394_v7  ;;  %248 = vmatpush.bf16.msra.mxu2 %v398_v8  ;;  %v382_v16 = vor.u32 %v431_v11, %v379_v13  ;;  %v386_v17 = vor.u32 %v433_v15, %v385_v14  ;;  %v423_v18 = vld [vmem:[%s749_s0] sm:$0xff]  ;;  %v429_v19 = vld [vmem:[%s749_s0 + $0x30] sm:$0xff]  ;;  %v424_v20 = vld [vmem:[%s749_s0 + $0x8] sm:$0xff] }
   0x6   :  { %v430_v21 = vld [vmem:[%s749_s0 + $0x38] sm:$0xff]  ;;  %v425_v22 = vld [vmem:[%s749_s0 + $0x10] sm:$0xff]  ;;  %v427_v24 = vld [vmem:[%s749_s0 + $0x20] sm:$0xff] }
   0x7   :  { %v426_v23 = vld [vmem:[%s749_s0 + $0x18] sm:$0xff]  ;;  %v428_v25 = vld [vmem:[%s749_s0 + $0x28] sm:$0xff]  ;;  %v39_v26 = vld [vmem:[%s750_s2] sm:$0x7] }
   0x8   :  { %151 = vmatpush.bf16.msra.mxu0 %v378_v12  ;;  %438 = vmatpush.bf16.msra.mxu3 %v378_v12  ;;  %v550_v27 = vperm.slane %v39_v26, 0  ;;  %v552_v28 = vperm.slane %v39_v26, 1  ;;  %v562_v33 = vperm.slane %v39_v26, 2 }
   0x9   :  { %200 = vmatpush.bf16.msra.mxu1 %v382_v16  ;;  %249 = vmatpush.bf16.msra.mxu2 %v386_v17 }
   0xb   :  { %399 = vmatmul.msk.bf16.vlgmr.msra.gmra.mxu0 %vm119_vm0, %v423_v18  ;;  %405 = vmatmul.msk.bf16.vlgmr.msra.gmra.mxu3 %vm119_vm0, %v429_v19 }
   0xc   :  { %439 = vmatpush.bf16.msrb.mxu3 %v394_v7  ;;  %407 = vmatmul.msk.bf16.vlgmr.msra.gmra.mxu1 %vm119_vm0, %v423_v18 }
   0xd   :  { %415 = vmatmul.msk.bf16.vlgmr.msra.gmra.mxu2 %vm119_vm0, %v423_v18 }
  0x10   :  { %440 = vmatpush.bf16.msrb.mxu3 %v382_v16 }
  0x14   :  { %441 = vmatpush.bf16.msra.mxu3 %v398_v8 }
  0x18   :  { %442 = vmatpush.bf16.msra.mxu3 %v386_v17 }
  0x1b   :  { %400 = vmatmul.msk.bf16.gmra.mxu0 %vm119_vm0, %v424_v20  ;;  %406 = vmatmul.msk.bf16.gmra.mxu3 %vm119_vm0, %v430_v21 }
  0x1c   :  { %408 = vmatmul.msk.bf16.gmra.mxu1 %vm119_vm0, %v424_v20 }
  0x1d   :  { %416 = vmatmul.msk.bf16.gmra.mxu2 %vm119_vm0, %v424_v20 }
  0x2b   :  { %401 = vmatmul.msk.bf16.gmra.mxu0 %vm119_vm0, %v425_v22  ;;  %413 = vmatmul.msk.bf16.vlgmr.msrb.gmra.mxu3 %vm119_vm0, %v429_v19 }
  0x2c   :  { %409 = vmatmul.msk.bf16.gmra.mxu1 %vm119_vm0, %v425_v22 }
  0x2d   :  { %417 = vmatmul.msk.bf16.gmra.mxu2 %vm119_vm0, %v425_v22 }
  0x3b   :  { %402 = vmatmul.msk.bf16.gmra.mxu0 %vm119_vm0, %v426_v23  ;;  %414 = vmatmul.msk.bf16.gmra.mxu3 %vm119_vm0, %v430_v21 }
  0x3c   :  { %410 = vmatmul.msk.bf16.gmra.mxu1 %vm119_vm0, %v426_v23 }
  0x3d   :  { %418 = vmatmul.msk.bf16.gmra.mxu2 %vm119_vm0, %v426_v23 }
  0x4b   :  { %403 = vmatmul.msk.bf16.gmra.mxu0 %vm119_vm0, %v427_v24  ;;  %421 = vmatmul.msk.bf16.vlgmr.msra.gmra.mxu3 %vm119_vm0, %v429_v19 }
  0x4c   :  { %411 = vmatmul.msk.bf16.gmra.mxu1 %vm119_vm0, %v427_v24 }
  0x4d   :  { %419 = vmatmul.msk.bf16.gmra.mxu2 %vm119_vm0, %v427_v24 }
  0x5b   :  { %404 = vmatmul.msk.bf16.gmra.mxu0 %vm119_vm0, %v428_v25  ;;  %422 = vmatmul.msk.bf16.gmra.mxu3 %vm119_vm0, %v430_v21 }
  0x5c   :  { %412 = vmatmul.msk.bf16.gmra.mxu1 %vm119_vm0, %v428_v25 }
  0x5d   :  { %420 = vmatmul.msk.bf16.gmra.mxu2 %vm119_vm0, %v428_v25 }
  0x88   :  { %v153_v29 = vpop.f32.mrf.mxu0 }
  0x89   :  { %v154_v30 = vadd.f32 %v153_v29, %v550_v27  ;;  %v202_v31 = vpop.f32.mrf.mxu1 }
  0x8a   :  { %v203_v32 = vadd.f32 %v202_v31, %v552_v28 }
  0x8b   :  { %291 = vst [vmem:[%s751_s3] sm:$0xff] %v154_v30 }
  0x8c   :  { %292 = vst [vmem:[%s751_s3 + $0x8] sm:$0xff] %v203_v32 }
  0x8e   :  { %v183_v34 = vpop.f32.mrf.mxu3 }
  0x8f   :  { %v184_v35 = vadd.f32 %v183_v34, %v550_v27 }
  0x90   :  { %v251_v36 = vpop.f32.mrf.mxu2  ;;  %v155_v38 = vpop.f32.mrf.mxu0 }
  0x91   :  { %v252_v37 = vadd.f32 %v251_v36, %v562_v33  ;;  %327 = vst [vmem:[%s751_s3 + $0x120] sm:$0xff] %v184_v35  ;;  %v156_v39 = vadd.f32 %v155_v38, %v550_v27  ;;  %v204_v40 = vpop.f32.mrf.mxu1 }
  0x92   :  { %v205_v41 = vadd.f32 %v204_v40, %v552_v28 }
  0x93   :  { %293 = vst [vmem:[%s751_s3 + $0x10] sm:$0xff] %v252_v37 }
  0x94   :  { %294 = vst [vmem:[%s751_s3 + $0x18] sm:$0xff] %v156_v39 }
  0x95   :  { %295 = vst [vmem:[%s751_s3 + $0x20] sm:$0xff] %v205_v41 }
  0x96   :  { %v185_v42 = vpop.f32.mrf.mxu3 }
  0x97   :  { %v186_v43 = vadd.f32 %v185_v42, %v550_v27 }
  0x98   :  { %v253_v44 = vpop.f32.mrf.mxu2  ;;  %v158_v46 = vpop.f32.mrf.mxu0 }
  0x99   :  { %v254_v45 = vadd.f32 %v253_v44, %v562_v33  ;;  %330 = vst [vmem:[%s751_s3 + $0x138] sm:$0xff] %v186_v43  ;;  %v159_v47 = vadd.f32 %v158_v46, %v550_v27  ;;  %v207_v48 = vpop.f32.mrf.mxu1 }
  0x9a   :  { %v208_v49 = vadd.f32 %v207_v48, %v552_v28 }
  0x9b   :  { %296 = vst [vmem:[%s751_s3 + $0x28] sm:$0xff] %v254_v45 }
  0x9c   :  { %297 = vst [vmem:[%s751_s3 + $0x30] sm:$0xff] %v159_v47 }
  0x9d   :  { %298 = vst [vmem:[%s751_s3 + $0x38] sm:$0xff] %v208_v49 }
  0x9e   :  { %v188_v50 = vpop.f32.mrf.mxu3 }
  0x9f   :  { %v189_v51 = vadd.f32 %v188_v50, %v550_v27 }
  0xa0   :  { %v256_v52 = vpop.f32.mrf.mxu2  ;;  %v160_v54 = vpop.f32.mrf.mxu0 }
  0xa1   :  { %v257_v53 = vadd.f32 %v256_v52, %v562_v33  ;;  %333 = vst [vmem:[%s751_s3 + $0x150] sm:$0xff] %v189_v51  ;;  %v161_v55 = vadd.f32 %v160_v54, %v550_v27  ;;  %v209_v56 = vpop.f32.mrf.mxu1 }
  0xa2   :  { %v210_v57 = vadd.f32 %v209_v56, %v552_v28 }
  0xa3   :  { %299 = vst [vmem:[%s751_s3 + $0x40] sm:$0xff] %v257_v53 }
  0xa4   :  { %300 = vst [vmem:[%s751_s3 + $0x48] sm:$0xff] %v161_v55 }
  0xa5   :  { %301 = vst [vmem:[%s751_s3 + $0x50] sm:$0xff] %v210_v57 }
  0xa6   :  { %v190_v58 = vpop.f32.mrf.mxu3 }
  0xa7   :  { %v191_v59 = vadd.f32 %v190_v58, %v550_v27 }
  0xa8   :  { %v258_v60 = vpop.f32.mrf.mxu2  ;;  %v163_v62 = vpop.f32.mrf.mxu0 }
  0xa9   :  { %v259_v61 = vadd.f32 %v258_v60, %v562_v33  ;;  %336 = vst [vmem:[%s751_s3 + $0x168] sm:$0xff] %v191_v59  ;;  %v164_v63 = vadd.f32 %v163_v62, %v550_v27  ;;  %v212_v0 = vpop.f32.mrf.mxu1 }
  0xaa   :  { %v213_v1 = vadd.f32 %v212_v0, %v552_v28 }
  0xab   :  { %302 = vst [vmem:[%s751_s3 + $0x58] sm:$0xff] %v259_v61 }
  0xac   :  { %303 = vst [vmem:[%s751_s3 + $0x60] sm:$0xff] %v164_v63 }
  0xad   :  { %304 = vst [vmem:[%s751_s3 + $0x68] sm:$0xff] %v213_v1 }
  0xae   :  { %v232_v2 = vpop.f32.mrf.mxu3 }
  0xaf   :  { %v233_v3 = vadd.f32 %v232_v2, %v552_v28 }
  0xb0   :  { %v261_v4 = vpop.f32.mrf.mxu2  ;;  %v165_v6 = vpop.f32.mrf.mxu0 }
  0xb1   :  { %v262_v5 = vadd.f32 %v261_v4, %v562_v33  ;;  %328 = vst [vmem:[%s751_s3 + $0x128] sm:$0xff] %v233_v3  ;;  %v166_v7 = vadd.f32 %v165_v6, %v550_v27  ;;  %v214_v8 = vpop.f32.mrf.mxu1 }
  0xb2   :  { %v215_v9 = vadd.f32 %v214_v8, %v552_v28 }
  0xb3   :  { %305 = vst [vmem:[%s751_s3 + $0x70] sm:$0xff] %v262_v5 }
  0xb4   :  { %306 = vst [vmem:[%s751_s3 + $0x78] sm:$0xff] %v166_v7 }
  0xb5   :  { %307 = vst [vmem:[%s751_s3 + $0x80] sm:$0xff] %v215_v9 }
  0xb6   :  { %v234_v10 = vpop.f32.mrf.mxu3 }
  0xb7   :  { %v235_v11 = vadd.f32 %v234_v10, %v552_v28 }
  0xb8   :  { %v263_v12 = vpop.f32.mrf.mxu2  ;;  %v168_v14 = vpop.f32.mrf.mxu0 }
  0xb9   :  { %v264_v13 = vadd.f32 %v263_v12, %v562_v33  ;;  %331 = vst [vmem:[%s751_s3 + $0x140] sm:$0xff] %v235_v11  ;;  %v169_v15 = vadd.f32 %v168_v14, %v550_v27  ;;  %v217_v16 = vpop.f32.mrf.mxu1 }
  0xba   :  { %v218_v17 = vadd.f32 %v217_v16, %v552_v28 }
  0xbb   :  { %308 = vst [vmem:[%s751_s3 + $0x88] sm:$0xff] %v264_v13 }
  0xbc   :  { %309 = vst [vmem:[%s751_s3 + $0x90] sm:$0xff] %v169_v15 }
  0xbd   :  { %310 = vst [vmem:[%s751_s3 + $0x98] sm:$0xff] %v218_v17 }
  0xbe   :  { %v237_v18 = vpop.f32.mrf.mxu3 }
  0xbf   :  { %v238_v19 = vadd.f32 %v237_v18, %v552_v28 }
  0xc0   :  { %v266_v20 = vpop.f32.mrf.mxu2  ;;  %v170_v22 = vpop.f32.mrf.mxu0 }
  0xc1   :  { %v267_v21 = vadd.f32 %v266_v20, %v562_v33  ;;  %334 = vst [vmem:[%s751_s3 + $0x158] sm:$0xff] %v238_v19  ;;  %v171_v23 = vadd.f32 %v170_v22, %v550_v27  ;;  %v219_v24 = vpop.f32.mrf.mxu1 }
  0xc2   :  { %v220_v25 = vadd.f32 %v219_v24, %v552_v28 }
  0xc3   :  { %311 = vst [vmem:[%s751_s3 + $0xa0] sm:$0xff] %v267_v21 }
  0xc4   :  { %312 = vst [vmem:[%s751_s3 + $0xa8] sm:$0xff] %v171_v23 }
  0xc5   :  { %313 = vst [vmem:[%s751_s3 + $0xb0] sm:$0xff] %v220_v25 }
  0xc6   :  { %v239_v26 = vpop.f32.mrf.mxu3 }
  0xc7   :  { %v240_v29 = vadd.f32 %v239_v26, %v552_v28 }
  0xc8   :  { %v268_v30 = vpop.f32.mrf.mxu2  ;;  %v173_v32 = vpop.f32.mrf.mxu0 }
  0xc9   :  { %v269_v31 = vadd.f32 %v268_v30, %v562_v33  ;;  %337 = vst [vmem:[%s751_s3 + $0x170] sm:$0xff] %v240_v29  ;;  %v174_v34 = vadd.f32 %v173_v32, %v550_v27  ;;  %v222_v35 = vpop.f32.mrf.mxu1 }
  0xca   :  { %v223_v36 = vadd.f32 %v222_v35, %v552_v28 }
  0xcb   :  { %314 = vst [vmem:[%s751_s3 + $0xb8] sm:$0xff] %v269_v31 }
  0xcc   :  { %315 = vst [vmem:[%s751_s3 + $0xc0] sm:$0xff] %v174_v34 }
  0xcd   :  { %316 = vst [vmem:[%s751_s3 + $0xc8] sm:$0xff] %v223_v36 }
  0xce   :  { %v281_v37 = vpop.f32.mrf.mxu3 }
  0xcf   :  { %v282_v39 = vadd.f32 %v281_v37, %v562_v33 }
  0xd0   :  { %v271_v38 = vpop.f32.mrf.mxu2  ;;  %v175_v41 = vpop.f32.mrf.mxu0 }
  0xd1   :  { %v272_v40 = vadd.f32 %v271_v38, %v562_v33  ;;  %329 = vst [vmem:[%s751_s3 + $0x130] sm:$0xff] %v282_v39  ;;  %v176_v42 = vadd.f32 %v175_v41, %v550_v27  ;;  %v224_v43 = vpop.f32.mrf.mxu1 }
  0xd2   :  { %v225_v44 = vadd.f32 %v224_v43, %v552_v28 }
  0xd3   :  { %317 = vst [vmem:[%s751_s3 + $0xd0] sm:$0xff] %v272_v40 }
  0xd4   :  { %318 = vst [vmem:[%s751_s3 + $0xd8] sm:$0xff] %v176_v42 }
  0xd5   :  { %319 = vst [vmem:[%s751_s3 + $0xe0] sm:$0xff] %v225_v44 }
  0xd6   :  { %v283_v45 = vpop.f32.mrf.mxu3 }
  0xd7   :  { %v284_v47 = vadd.f32 %v283_v45, %v562_v33 }
  0xd8   :  { %v273_v46 = vpop.f32.mrf.mxu2  ;;  %v178_v49 = vpop.f32.mrf.mxu0 }
  0xd9   :  { %v274_v48 = vadd.f32 %v273_v46, %v562_v33  ;;  %332 = vst [vmem:[%s751_s3 + $0x148] sm:$0xff] %v284_v47  ;;  %v179_v50 = vadd.f32 %v178_v49, %v550_v27  ;;  %v227_v51 = vpop.f32.mrf.mxu1 }
  0xda   :  { %v228_v52 = vadd.f32 %v227_v51, %v552_v28 }
  0xdb   :  { %320 = vst [vmem:[%s751_s3 + $0xe8] sm:$0xff] %v274_v48 }
  0xdc   :  { %321 = vst [vmem:[%s751_s3 + $0xf0] sm:$0xff] %v179_v50 }
  0xdd   :  { %322 = vst [vmem:[%s751_s3 + $0xf8] sm:$0xff] %v228_v52 }
  0xde   :  { %v286_v53 = vpop.f32.mrf.mxu3 }
  0xdf   :  { %v287_v55 = vadd.f32 %v286_v53, %v562_v33 }
  0xe0   :  { %v276_v54 = vpop.f32.mrf.mxu2  ;;  %v180_v57 = vpop.f32.mrf.mxu0 }
  0xe1   :  { %v277_v56 = vadd.f32 %v276_v54, %v562_v33  ;;  %335 = vst [vmem:[%s751_s3 + $0x160] sm:$0xff] %v287_v55  ;;  %v181_v58 = vadd.f32 %v180_v57, %v550_v27  ;;  %v229_v59 = vpop.f32.mrf.mxu1 }
  0xe2   :  { %v230_v60 = vadd.f32 %v229_v59, %v552_v28 }
  0xe3   :  { %323 = vst [vmem:[%s751_s3 + $0x100] sm:$0xff] %v277_v56 }
  0xe4   :  { %324 = vst [vmem:[%s751_s3 + $0x108] sm:$0xff] %v181_v58 }
  0xe5   :  { %325 = vst [vmem:[%s751_s3 + $0x110] sm:$0xff] %v230_v60 }
  0xe6   :  { %v288_v61 = vpop.f32.mrf.mxu3 }
  0xe7   :  { %v289_v63 = vadd.f32 %v288_v61, %v562_v33 }
  0xe8   :  { %v278_v62 = vpop.f32.mrf.mxu2 }
  0xe9   :  { %v279_v27 = vadd.f32 %v278_v62, %v562_v33  ;;  %338 = vst [vmem:[%s751_s3 + $0x178] sm:$0xff] %v289_v63 }
  0xeb   :  { %326 = vst [vmem:[%s751_s3 + $0x118] sm:$0xff] %v279_v27 }

// kernel: u_encoder_forward.3
= control target key start
LH: loop header
LB: loop body
LE: loop exit
PB: predicated region body
PF: predicated region fallthrough
CT: control target
= control target key end

     0   :  { %s1619_s15 = smov 0   ;;  %s1621_s16 = smov 0   ;;  %s2178_s0 = inlined_call_operand.vmem [shape: s32[8,1], index: 0, kind: input, shape index: {}]   ;;  %s2179_s1 = inlined_call_operand.vmem [shape: f32[16,8,384], index: 1, kind: input, shape index: {}]   ;;  %s2180_s2 = inlined_call_operand.vmem [shape: bf16[128,384], index: 2, kind: input, shape index: {}]   ;;  %s2181_s3 = inlined_call_operand.vmem [shape: f32[1,384], index: 3, kind: input, shape index: {}]   ;;  %s2182_s4 = inlined_call_operand.vmem [shape: f32[8,128], index: 4, kind: output, shape index: {}]  }
   0x1   :  { %s1623_s17 = smov 0  }
   0x2 LB: > { %s23_s18 = sadd.s32 1, %s1586_s16  ;;  %p1293_p0 = scmp.ge.s32.totalorder %s1590_s17, 1  ;;  %s1590_s17 = sphi %s1623_s17, %s14_s17   ;;  %s1586_s16 = sphi %s1621_s16, %s2184_s16   ;;  %s1582_s15 = sphi %s1619_s15, %s2183_s15  }
   0x3   : > { %p24_p1 = scmp.ge.s32.totalorder %s23_s18, 2  ;;  %p191_p2 = scmp.lt.s32.totalorder %s1590_s17, 3 }
   0x5   : > { %s2186_s18 = smov (%p24_p1, %s23_s18), 0  ;;  %p192_p3 = pnand %p1293_p0, %p191_p2 }
   0x6   : > { %s1637_s19 = sshll.u32 (!%p192_p3), %s1582_s15, 3  ;;  %p1296_p5 = scmp.ne.s32.totalorder (!%p192_p3), %s1582_s15, 0 }
   0x7   : > { %195 = sbr.rel (%p192_p3) target bundleno = 1485 (0x5cd), region = 36  ;;  %p230_p4 = scmp.lt.s32.totalorder (!%p192_p3), %s1637_s19, 15 }
   0xc   : > { %s231_s20 = scalar_select %p230_p4, %s1637_s19, 15 }
   0xd   : > { %247 = sbr.rel (%p1296_p5) target bundleno = 20 (0x14), region = 40 }
   0xe   : > { %s1458_s21 = smul.u32 24, %s231_s20 }
  0x10   : > { %s1644_s24 = scalar_lea.vmem %s2179_s1, %s1458_s21 }
  0x12   : > { %v1592_v0 = vmov 0.0  }
  0x13   : > { %248 = vst [vmem:[%s2182_s4] sm:$0xff] %v1592_v0 }
  0x14 PF: > { %v1384_v1 = vld [vmem:[%s2180_s2 + $0xa8] sm:$0xf]  ;;  %v1456_v2 = vld [vmem:[%s2180_s2 + $0xb0] sm:$0xf0]  ;;  %v1455_v3 = vld [vmem:[%s2180_s2 + $0xac] sm:$0xf]  ;;  %v285_v39 = vstv %s1637_s19 }
  0x15   : > { %v1658_v4 = vor.u32 %v1456_v2, %v1384_v1  ;;  %v1386_v5 = vld [vmem:[%s2180_s2 + $0xb4] sm:$0xf0]  ;;  %v1372_v6 = vld [vmem:[%s2180_s2 + $0x90] sm:$0xf]  ;;  %v1453_v7 = vld [vmem:[%s2180_s2 + $0x98] sm:$0xf0] }
  0x16   : > { %v1669_v8 = vor.u32 %v1455_v3, %v1386_v5  ;;  %v1452_v9 = vld [vmem:[%s2180_s2 + $0x94] sm:$0xf]  ;;  %v1374_v10 = vld [vmem:[%s2180_s2 + $0x9c] sm:$0xf0]  ;;  %v1678_v11 = vor.u32 %v1453_v7, %v1372_v6  ;;  %v1360_v13 = vld [vmem:[%s2180_s2 + $0x78] sm:$0xf] }
  0x17   : > { %426 = vmatpush.bf16.msra.mxu0 %v1658_v4  ;;  %524 = vmatpush.bf16.msra.mxu3 %v1658_v4  ;;  %v1682_v12 = vor.u32 %v1452_v9, %v1374_v10  ;;  %v1450_v14 = vld [vmem:[%s2180_s2 + $0x80] sm:$0xf0]  ;;  %v1449_v15 = vld [vmem:[%s2180_s2 + $0x7c] sm:$0xf]  ;;  %v1362_v16 = vld [vmem:[%s2180_s2 + $0x84] sm:$0xf0] }
  0x18   : > { %439 = vmatpush.bf16.msra.mxu1 %v1669_v8  ;;  %v1392_v17 = vld [vmem:[%s2180_s2 + $0xb0] sm:$0xf]  ;;  %v1700_v18 = vor.u32 %v1450_v14, %v1360_v13  ;;  %v1457_v19 = vld [vmem:[%s2180_s2 + $0xb8] sm:$0xf0]  ;;  %v1707_v20 = vor.u32 %v1449_v15, %v1362_v16  ;;  %v1348_v21 = vld [vmem:[%s2180_s2 + $0x60] sm:$0xf] }
  0x19   : > { %v1447_v22 = vld [vmem:[%s2180_s2 + $0x68] sm:$0xf0]  ;;  %v1715_v23 = vor.u32 %v1457_v19, %v1392_v17  ;;  %v1380_v24 = vld [vmem:[%s2180_s2 + $0x98] sm:$0xf]  ;;  %v1446_v25 = vld [vmem:[%s2180_s2 + $0x64] sm:$0xf] }
  0x1a   : > { %v1350_v26 = vld [vmem:[%s2180_s2 + $0x6c] sm:$0xf0]  ;;  %v1454_v27 = vld [vmem:[%s2180_s2 + $0xa0] sm:$0xf0]  ;;  %v1733_v29 = vor.u32 %v1447_v22, %v1348_v21  ;;  %v1368_v30 = vld [vmem:[%s2180_s2 + $0x80] sm:$0xf] }
  0x1b   : > { %427 = vmatpush.bf16.msra.mxu0 %v1678_v11  ;;  %525 = vmatpush.bf16.msra.mxu3 %v1678_v11  ;;  %v1730_v28 = vor.u32 %v1454_v27, %v1380_v24  ;;  %v1451_v31 = vld [vmem:[%s2180_s2 + $0x88] sm:$0xf0]  ;;  %v1743_v32 = vor.u32 %v1446_v25, %v1350_v26  ;;  %v1336_v33 = vld [vmem:[%s2180_s2 + $0x48] sm:$0xf]  ;;  %v1444_v34 = vld [vmem:[%s2180_s2 + $0x50] sm:$0xf0] }
  0x1c   : > { %440 = vmatpush.bf16.msra.mxu1 %v1682_v12  ;;  %452 = vmatpush.bf16.msra.mxu2 %v1715_v23  ;;  %v1443_v35 = vld [vmem:[%s2180_s2 + $0x4c] sm:$0xf]  ;;  %v1338_v36 = vld [vmem:[%s2180_s2 + $0x54] sm:$0xf0]  ;;  %v1758_v37 = vor.u32 %v1451_v31, %v1368_v30  ;;  %v1593_v38 = vmov 0   ;;  %v1763_v40 = vor.u32 %v1444_v34, %v1336_v33  ;;  %v283_v46 = vld [vmem:[%s2178_s0] sm:$0xff] }
  0x1d   : > { %1485 = vset.pattern.permute.xlu0 %v1593_v38  ;;  %v1356_v41 = vld [vmem:[%s2180_s2 + $0x68] sm:$0xf]  ;;  %v1448_v42 = vld [vmem:[%s2180_s2 + $0x70] sm:$0xf0]  ;;  %v1773_v43 = vor.u32 %v1443_v35, %v1338_v36  ;;  %v1324_v44 = vld [vmem:[%s2180_s2 + $0x30] sm:$0xf]  ;;  %1486 = vset.pattern.permute.xlu1 %v1593_v38  ;;  %v1791_v49 = vsub.s32 %v283_v46, %v285_v39 }
  0x1e   : > { %v1441_v45 = vld [vmem:[%s2180_s2 + $0x38] sm:$0xf0]  ;;  %v1440_v47 = vld [vmem:[%s2180_s2 + $0x34] sm:$0xf]  ;;  %v1326_v48 = vld [vmem:[%s2180_s2 + $0x3c] sm:$0xf0]  ;;  %1487 = vset.pattern.permute.xlu2 %v1593_v38  ;;  %v1795_v50 = vor.u32 %v1448_v42, %v1356_v41 }
  0x1f   : > { %428 = vmatpush.bf16.msra.mxu0 %v1700_v18  ;;  %526 = vmatpush.bf16.msra.mxu3 %v1700_v18  ;;  %v1798_v51 = vor.u32 %v1441_v45, %v1324_v44  ;;  %v1344_v52 = vld [vmem:[%s2180_s2 + $0x50] sm:$0xf]  ;;  %v1445_v53 = vld [vmem:[%s2180_s2 + $0x58] sm:$0xf0]  ;;  %vm512_vm0 = vcmp.gt.s32.totalorder %v1791_v49, 0  ;;  %v1809_v54 = vor.u32 %v1440_v47, %v1326_v48  ;;  %vm610_vm1 = vcmp.gt.s32.totalorder %v1791_v49, 1 }
  0x20   : > { %441 = vmatpush.bf16.msra.mxu1 %v1707_v20  ;;  %453 = vmatpush.bf16.msra.mxu2 %v1730_v28  ;;  %v1312_v55 = vld [vmem:[%s2180_s2 + $0x18] sm:$0xf]  ;;  %v1438_v56 = vld [vmem:[%s2180_s2 + $0x20] sm:$0xf0]  ;;  %v513_v57 = vsel %vm512_vm0, 1, %v1593_v38  ;;  %v1825_v60 = vor.u32 %v1445_v53, %v1344_v52  ;;  %v611_v7 = vsel %vm610_vm1, 1, %v1593_v38 }
  0x21   : > { %v1437_v58 = vld [vmem:[%s2180_s2 + $0x1c] sm:$0xf]  ;;  %v1314_v59 = vld [vmem:[%s2180_s2 + $0x24] sm:$0xf0]  ;;  %515 = vperm.xlu0 %1485, %v513_v57   ;;  %v1828_v61 = vor.u32 %v1438_v56, %v1312_v55  ;;  %v1332_v62 = vld [vmem:[%s2180_s2 + $0x38] sm:$0xf] }
  0x22   : > { %v1442_v63 = vld [vmem:[%s2180_s2 + $0x40] sm:$0xf0]  ;;  %v1839_v0 = vor.u32 %v1437_v58, %v1314_v59  ;;  %v1300_v1 = vld [vmem:[%s2180_s2] sm:$0xf]  ;;  %v1435_v2 = vld [vmem:[%s2180_s2 + $0x8] sm:$0xf0] }
  0x23   : > { %429 = vmatpush.bf16.msra.mxu0 %v1733_v29  ;;  %527 = vmatpush.bf16.msra.mxu3 %v1733_v29  ;;  %v1434_v3 = vld [vmem:[%s2180_s2 + $0x4] sm:$0xf]  ;;  %v1302_v5 = vld [vmem:[%s2180_s2 + $0xc] sm:$0xf0]  ;;  %v1854_v6 = vor.u32 %v1442_v63, %v1332_v62  ;;  %v1858_v9 = vor.u32 %v1435_v2, %v1300_v1  ;;  %v1320_v13 = vld [vmem:[%s2180_s2 + $0x20] sm:$0xf] }
  0x24   : > { %442 = vmatpush.bf16.msra.mxu1 %v1743_v32  ;;  %454 = vmatpush.bf16.msra.mxu2 %v1758_v37  ;;  %v1863_v10 = vld [vmem:[%s2182_s4] sm:$0xff]  ;;  %v1439_v14 = vld [vmem:[%s2180_s2 + $0x28] sm:$0xf0]  ;;  %v1873_v15 = vor.u32 %v1434_v3, %v1302_v5  ;;  %v1308_v19 = vld [vmem:[%s2180_s2 + $0x8] sm:$0xf]  ;;  %vm1100_vm2 = vcmp.gt.s32.totalorder %v1791_v49, 6 }
  0x25   : > { %v290_v16 = vpack.c.bf16 %v1863_v10, %v1863_v10  ;;  %v1878_v17 = vor.u32 %v1439_v14, %v1320_v13  ;;  %v1436_v21 = vld [vmem:[%s2180_s2 + $0x10] sm:$0xf0]  ;;  %v1101_v24 = vsel %vm1100_vm2, 1, %v1593_v38  ;;  %v282_v25 = vld [vmem:[%s2181_s3] sm:$0x7]  ;;  %v288_v34 = vld [vmem:[%s1644_s24 + $0x8] sm:$0xff] }
  0x26   : > { %v1894_v22 = vor.u32 %v1436_v21, %v1308_v19  ;;  %v1954_v26 = vperm.slane %v282_v25, 0  ;;  %v1956_v27 = vperm.slane %v282_v25, 1  ;;  %v287_v30 = vld [vmem:[%s1644_s24] sm:$0xff]  ;;  %v1962_v63 = vperm.slane %v282_v25, 2 }
  0x27   : > { %430 = vmatpush.bf16.msra.mxu0 %v1763_v40  ;;  %528 = vmatpush.bf16.msra.mxu3 %v1763_v40  ;;  %vm708_vm12 = vcmp.gt.s32.totalorder %v1791_v49, 2  ;;  %vm806_vm13 = vcmp.gt.s32.totalorder %v1791_v49, 3 }
  0x28   : > { %443 = vmatpush.bf16.msra.mxu1 %v1773_v43  ;;  %455 = vmatpush.bf16.msra.mxu2 %v1795_v50 }
  0x29   : > { %613 = vperm.xlu0 %1485, %v611_v7  }
  0x2b   : > { %431 = vmatpush.bf16.msra.mxu0 %v1798_v51  ;;  %529 = vmatpush.bf16.msra.mxu3 %v1798_v51 }
  0x2c   : > { %444 = vmatpush.bf16.msra.mxu1 %v1809_v54  ;;  %456 = vmatpush.bf16.msra.mxu2 %v1825_v60 }
  0x2f   : > { %432 = vmatpush.bf16.msra.mxu0 %v1828_v61  ;;  %530 = vmatpush.bf16.msra.mxu3 %v1828_v61 }
  0x30   : > { %445 = vmatpush.bf16.msra.mxu1 %v1839_v0  ;;  %457 = vmatpush.bf16.msra.mxu2 %v1854_v6 }
  0x31   : > { %1103 = vperm.xlu0 %1485, %v1101_v24   ;;  %v289_v24 = vld [vmem:[%s1644_s24 + $0x10] sm:$0xff] }
  0x33   : > { %433 = vmatpush.bf16.msra.mxu0 %v1858_v9  ;;  %531 = vmatpush.bf16.msra.mxu3 %v1858_v9 }
  0x34   : > { %446 = vmatpush.bf16.msra.mxu1 %v1873_v15  ;;  %458 = vmatpush.bf16.msra.mxu2 %v1878_v17 }
  0x36   : > { %434 = vmatmul.bf16.vlgmr.msra.gmra.mxu0 %v290_v16 }
  0x37   : > { %537 = vmatpush.bf16.msrb.mxu0 %v1669_v8  ;;  %635 = vmatpush.bf16.msrb.mxu3 %v1669_v8 }
  0x38   : > { %550 = vmatpush.bf16.msrb.mxu1 %v1715_v23  ;;  %459 = vmatpush.bf16.msra.mxu2 %v1894_v22 }
  0x39   : > { %447 = vmatmul.bf16.vlgmr.msra.gmra.mxu1 %v290_v16 }
  0x3b   : > { %538 = vmatpush.bf16.msrb.mxu0 %v1682_v12  ;;  %636 = vmatpush.bf16.msrb.mxu3 %v1682_v12 }
  0x3c   : > { %551 = vmatpush.bf16.msrb.mxu1 %v1730_v28  ;;  %622 = vmatpush.bf16.msrb.mxu2 %v1658_v4 }
  0x3d   : > { %460 = vmatmul.bf16.vlgmr.msra.gmra.mxu2 %v290_v16 }
  0x3f   : > { %539 = vmatpush.bf16.msrb.mxu0 %v1707_v20  ;;  %637 = vmatpush.bf16.msrb.mxu3 %v1707_v20 }
  0x40   : > { %552 = vmatpush.bf16.msrb.mxu1 %v1758_v37  ;;  %623 = vmatpush.bf16.msrb.mxu2 %v1678_v11 }
  0x43   : > { %540 = vmatpush.bf16.msrb.mxu0 %v1743_v32  ;;  %638 = vmatpush.bf16.msrb.mxu3 %v1743_v32 }
  0x44   : > { %553 = vmatpush.bf16.msrb.mxu1 %v1795_v50  ;;  %624 = vmatpush.bf16.msrb.mxu2 %v1700_v18 }
  0x47   : > { %541 = vmatpush.bf16.msrb.mxu0 %v1773_v43  ;;  %639 = vmatpush.bf16.msrb.mxu3 %v1773_v43 }
  0x48   : > { %554 = vmatpush.bf16.msrb.mxu1 %v1825_v60  ;;  %625 = vmatpush.bf16.msrb.mxu2 %v1733_v29 }
  0x4b   : > { %542 = vmatpush.bf16.msrb.mxu0 %v1809_v54  ;;  %640 = vmatpush.bf16.msrb.mxu3 %v1809_v54 }
  0x4c   : > { %555 = vmatpush.bf16.msrb.mxu1 %v1854_v6  ;;  %626 = vmatpush.bf16.msrb.mxu2 %v1763_v40 }
  0x4f   : > { %543 = vmatpush.bf16.msrb.mxu0 %v1839_v0  ;;  %641 = vmatpush.bf16.msrb.mxu3 %v1839_v0 }
  0x50   : > { %556 = vmatpush.bf16.msrb.mxu1 %v1878_v17  ;;  %627 = vmatpush.bf16.msrb.mxu2 %v1798_v51 }
  0x53   : > { %544 = vmatpush.bf16.msrb.mxu0 %v1873_v15  ;;  %642 = vmatpush.bf16.msrb.mxu3 %v1873_v15 }
  0x54   : > { %557 = vmatpush.bf16.msrb.mxu1 %v1894_v22  ;;  %628 = vmatpush.bf16.msrb.mxu2 %v1828_v61 }
  0x57   : > { %648 = vmatpush.bf16.msra.mxu0 %v1715_v23 }
  0x58   : > { %720 = vmatpush.bf16.msra.mxu1 %v1658_v4  ;;  %629 = vmatpush.bf16.msrb.mxu2 %v1858_v9 }
  0x5b   : > { %649 = vmatpush.bf16.msra.mxu0 %v1730_v28 }
  0x5c   : > { %721 = vmatpush.bf16.msra.mxu1 %v1678_v11  ;;  %733 = vmatpush.bf16.msra.mxu2 %v1669_v8 }
  0x5f   : > { %650 = vmatpush.bf16.msra.mxu0 %v1758_v37 }
  0x60   : > { %722 = vmatpush.bf16.msra.mxu1 %v1700_v18  ;;  %734 = vmatpush.bf16.msra.mxu2 %v1682_v12 }
  0x63   : > { %651 = vmatpush.bf16.msra.mxu0 %v1795_v50 }
  0x64   : > { %723 = vmatpush.bf16.msra.mxu1 %v1733_v29  ;;  %735 = vmatpush.bf16.msra.mxu2 %v1707_v20 }
  0x67   : > { %652 = vmatpush.bf16.msra.mxu0 %v1825_v60 }
  0x68   : > { %724 = vmatpush.bf16.msra.mxu1 %v1763_v40  ;;  %736 = vmatpush.bf16.msra.mxu2 %v1743_v32 }
  0x6b   : > { %653 = vmatpush.bf16.msra.mxu0 %v1854_v6 }
  0x6c   : > { %725 = vmatpush.bf16.msra.mxu1 %v1798_v51  ;;  %737 = vmatpush.bf16.msra.mxu2 %v1773_v43 }
  0x6f   : > { %654 = vmatpush.bf16.msra.mxu0 %v1878_v17 }
  0x70   : > { %726 = vmatpush.bf16.msra.mxu1 %v1828_v61  ;;  %738 = vmatpush.bf16.msra.mxu2 %v1809_v54 }
  0x73   : > { %655 = vmatpush.bf16.msra.mxu0 %v1894_v22 }
  0x74   : > { %727 = vmatpush.bf16.msra.mxu1 %v1858_v9  ;;  %739 = vmatpush.bf16.msra.mxu2 %v1839_v0 }
  0x78   : > { %740 = vmatpush.bf16.msra.mxu2 %v1873_v15 }
  0xb3   : > { %v435_v31 = vpop.f32.mrf.mxu0 }
  0xb4   : > { %v436_v33 = vadd.f32 %v435_v31, %v1954_v26 }
  0xb6   : > { %v448_v35 = vpop.f32.mrf.mxu1  ;;  %v465_v39 = vadd.f32 %v436_v33, %v287_v30 }
  0xb7   : > { %v449_v36 = vadd.f32 %v448_v35, %v1956_v27 }
  0xb8   : > { %v1394_v42 = vmul.f32 -1.442695, %v465_v39 }
  0xb9   : > { %v485_v41 = vadd.f32 %v449_v36, %v288_v34 }
  0xba   : > { %1488 = vpow2.f32 %v1394_v42 }
  0xbb   : > { %v1395_v44 = vmul.f32 -1.442695, %v485_v41  ;;  %v437_v45 = vpop.f32.mrf.mxu0 }
  0xbc   : > { %v516_v45 = vpop.permute.xlu0 %515 }
  0xbd   : > { %1490 = vpow2.f32 %v1395_v44  ;;  %vm517_vm11 = vcmp.eq.s32.totalorder %v516_v45, 1 }
  0xbe   : > { %v450_v46 = vpop.f32.mrf.mxu1 }
  0xc0   : > { %v1489_v47 = vpop.eup %1488  ;;  %v461_v48 = vpop.f32.mrf.mxu2 }
  0xc1   : > { %v469_v53 = vadd.f32 1.0, %v1489_v47  ;;  %v462_v14 = vadd.f32 %v461_v48, %v1962_v63 }
  0xc3   : > { %v1491_v52 = vpop.eup %1490  ;;  %1492 = vrcp.f32 %v469_v53  ;;  %v481_v3 = vand.u32 2147483648, %v469_v53  ;;  %v479_v7 = vand.u32 2147483647, %v469_v53  ;;  %vm475_vm4 = vweird.f32 %v469_v53 }
  0xc4   : > { %v489_v55 = vadd.f32 1.0, %v1491_v52 }
  0xc5   : > { %v482_v19 = vor.u32 1.1754944e-38, %v481_v3  ;;  %vm480_vm6 = vcmp.eq.f32.partialorder %v479_v7, 8.507059e+37 }
  0xc6   : > { %1494 = vrcp.f32 %v489_v55  ;;  %vm495_vm7 = vweird.f32 %v489_v55  ;;  %v501_v33 = vand.u32 2147483648, %v489_v55  ;;  %v499_v34 = vand.u32 2147483647, %v489_v55 }
  0xc8   : > { %v463_v56 = vpop.f32.mrf.mxu2  ;;  %v502_v39 = vor.u32 1.1754944e-38, %v501_v33  ;;  %vm500_vm10 = vcmp.eq.f32.partialorder %v499_v34, 8.507059e+37 }
  0xc9   : > { %v1493_v57 = vpop.eup %1492 }
  0xca   : > { %v471_v59 = vmul.f32 %v1493_v57, %v469_v53  ;;  %vm476_vm3 = vweird.f32 %v1493_v57 }
  0xcb   : > { %vm477_vm5 = vmor %vm475_vm4, %vm476_vm3  ;;  %vm1198_vm3 = vcmp.gt.s32.totalorder %v1791_v49, 7 }
  0xcc   : > { %v1495_v58 = vpop.eup %1494  ;;  %v472_v1 = vsub.f32 1.0, %v471_v59 }
  0xcd   : > { %v491_v62 = vmul.f32 %v1495_v58, %v489_v55  ;;  %vm496_vm8 = vweird.f32 %v1495_v58 }
  0xce   : > { %v473_v5 = vmul.f32 %v1493_v57, %v472_v1  ;;  %vm497_vm9 = vmor %vm495_vm7, %vm496_vm8 }
  0xcf   : > { %v492_v2 = vsub.f32 1.0, %v491_v62  ;;  %v1396_v62 = vld [vmem:[%s1644_s24 + $0x18] sm:$0xff] }
  0xd0   : > { %v474_v16 = vadd.f32 %v1493_v57, %v473_v5 }
  0xd1   : > { %v493_v13 = vmul.f32 %v1495_v58, %v492_v2 }
  0xd2   : > { %v478_v21 = vsel %vm477_vm5, %v1493_v57, %v474_v16 }
  0xd3   : > { %v483_v30 = vsel %vm480_vm6, %v482_v19, %v478_v21  ;;  %v494_v31 = vadd.f32 %v1495_v58, %v493_v13 }
  0xd4   : > { %v505_v25 = vmul.f32 %v483_v30, %v462_v14 }
  0xd5   : > { %v498_v36 = vsel %vm497_vm9, %v1495_v58, %v494_v31 }
  0xd6   : > { %v506_v35 = vadd.f32 %v505_v25, %v289_v24  ;;  %v503_v41 = vsel %vm500_vm10, %v502_v39, %v498_v36  ;;  %v709_v25 = vsel %vm708_vm12, 1, %v1593_v38 }
  0xd7   : > { %v508_v42 = vsub.f32 1.0, %v503_v41  ;;  %v510_v47 = vmul.f32 %v503_v41, %v1863_v10  ;;  %711 = vperm.xlu1 %1486, %v709_v25  }
  0xd8   : > { %1496 = vtanh.f32 %v506_v35 }
  0xde   : > { %v1497_v44 = vpop.eup %1496 }
  0xdf   : > { %v509_v46 = vmul.f32 %v1497_v44, %v508_v42  ;;  %v807_v44 = vsel %vm806_vm13, 1, %v1593_v38 }
  0xe0   : > { %809 = vperm.xlu1 %1486, %v807_v44  }
  0xe1   : > { %v511_v48 = vadd.f32 %v510_v47, %v509_v46 }
  0xe3   : > { %v1968_v52 = vsel %vm517_vm11, %v511_v48, %v1863_v10  ;;  %v1397_v10 = vld [vmem:[%s1644_s24 + $0x20] sm:$0xff] }
  0xe4   : > { %v523_v53 = vpack.c.bf16 %v1968_v52, %v1968_v52 }
  0xe6   : > { %532 = vmatmul.bf16.vlgmr.msra.gmra.mxu3 %v523_v53  ;;  %545 = vmatmul.bf16.vlgmr.msrb.gmra.mxu0 %v523_v53 }
  0xe7   : > { %558 = vmatmul.bf16.vlgmr.msrb.gmra.mxu1 %v523_v53  ;;  %746 = vmatpush.bf16.msra.mxu3 %v1715_v23 }
  0xe8   : > { %818 = vmatpush.bf16.msrb.mxu0 %v1658_v4  ;;  %831 = vmatpush.bf16.msrb.mxu1 %v1669_v8 }
  0xeb   : > { %747 = vmatpush.bf16.msra.mxu3 %v1730_v28 }
  0xec   : > { %819 = vmatpush.bf16.msrb.mxu0 %v1678_v11  ;;  %832 = vmatpush.bf16.msrb.mxu1 %v1682_v12 }
  0xef   : > { %748 = vmatpush.bf16.msra.mxu3 %v1758_v37 }
  0xf0   : > { %820 = vmatpush.bf16.msrb.mxu0 %v1700_v18  ;;  %833 = vmatpush.bf16.msrb.mxu1 %v1707_v20 }
  0xf3   : > { %749 = vmatpush.bf16.msra.mxu3 %v1795_v50 }
  0xf4   : > { %821 = vmatpush.bf16.msrb.mxu0 %v1733_v29  ;;  %834 = vmatpush.bf16.msrb.mxu1 %v1743_v32 }
  0xf7   : > { %750 = vmatpush.bf16.msra.mxu3 %v1825_v60 }
  0xf8   : > { %822 = vmatpush.bf16.msrb.mxu0 %v1763_v40  ;;  %835 = vmatpush.bf16.msrb.mxu1 %v1773_v43 }
  0xfb   : > { %751 = vmatpush.bf16.msra.mxu3 %v1854_v6 }
  0xfc   : > { %823 = vmatpush.bf16.msrb.mxu0 %v1798_v51  ;;  %836 = vmatpush.bf16.msrb.mxu1 %v1809_v54 }
  0xff   : > { %752 = vmatpush.bf16.msra.mxu3 %v1878_v17 }
 0x100   : > { %824 = vmatpush.bf16.msrb.mxu0 %v1828_v61  ;;  %837 = vmatpush.bf16.msrb.mxu1 %v1839_v0 }
 0x103   : > { %753 = vmatpush.bf16.msra.mxu3 %v1894_v22 }
 0x104   : > { %825 = vmatpush.bf16.msrb.mxu0 %v1858_v9  ;;  %838 = vmatpush.bf16.msrb.mxu1 %v1873_v15 }
 0x163   : > { %v546_v55 = vpop.f32.mrf.mxu0 }
 0x164   : > { %v547_v56 = vadd.f32 %v546_v55, %v1956_v27  ;;  %v559_v57 = vpop.f32.mrf.mxu1  ;;  %v1398_v55 = vld [vmem:[%s1644_s24 + $0x28] sm:$0xff] }
 0x165   : > { %v560_v48 = vadd.f32 %v559_v57, %v1962_v63 }
 0x166   : > { %v583_v58 = vadd.f32 %v1397_v10, %v547_v56 }
 0x168   : > { %v1400_v59 = vmul.f32 -1.442695, %v583_v58 }
 0x169   : > { %v533_v1 = vpop.f32.mrf.mxu3 }
 0x16a   : > { %1498 = vpow2.f32 %v1400_v59  ;;  %v534_v2 = vadd.f32 %v533_v1, %v1954_v26 }
 0x16b   : > { %v548_v3 = vpop.f32.mrf.mxu0 }
 0x16c   : > { %v563_v5 = vadd.f32 %v1396_v62, %v534_v2  ;;  %v561_v7 = vpop.f32.mrf.mxu1  ;;  %v1199_v2 = vsel %vm1198_vm3, 1, %v1593_v38 }
 0x16d   : > { %1201 = vperm.xlu1 %1486, %v1199_v2  }
 0x16e   : > { %v1399_v13 = vmul.f32 -1.442695, %v563_v5 }
 0x170   : > { %v1499_v14 = vpop.eup %1498  ;;  %1500 = vpow2.f32 %v1399_v13 }
 0x171   : > { %v587_v16 = vadd.f32 1.0, %v1499_v14  ;;  %v535_v19 = vpop.f32.mrf.mxu3 }
 0x173   : > { %1502 = vrcp.f32 %v587_v16  ;;  %v599_v58 = vand.u32 2147483648, %v587_v16  ;;  %vm593_vm4 = vweird.f32 %v587_v16  ;;  %v597_v62 = vand.u32 2147483647, %v587_v16 }
 0x175   : > { %v600_v5 = vor.u32 1.1754944e-38, %v599_v58  ;;  %vm598_vm6 = vcmp.eq.f32.partialorder %v597_v62, 8.507059e+37 }
 0x176   : > { %v1501_v21 = vpop.eup %1500 }
 0x177   : > { %v567_v24 = vadd.f32 1.0, %v1501_v21  ;;  %v614_v21 = vpop.permute.xlu0 %613 }
 0x178   : > { %vm615_vm7 = vcmp.eq.s32.totalorder %v614_v21, 1 }
 0x179   : > { %1504 = vrcp.f32 %v567_v24  ;;  %v1503_v30 = vpop.eup %1502  ;;  %v579_v39 = vand.u32 2147483648, %v567_v24  ;;  %v577_v42 = vand.u32 2147483647, %v567_v24  ;;  %vm573_vm15 = vweird.f32 %v567_v24 }
 0x17a   : > { %v589_v31 = vmul.f32 %v1503_v30, %v587_v16  ;;  %vm594_vm2 = vweird.f32 %v1503_v30 }
 0x17b   : > { %v580_v47 = vor.u32 1.1754944e-38, %v579_v39  ;;  %vm578_vm1 = vcmp.eq.f32.partialorder %v577_v42, 8.507059e+37  ;;  %vm595_vm5 = vmor %vm593_vm4, %vm594_vm2  ;;  %vm1002_vm2 = vcmp.gt.s32.totalorder %v1791_v49, 5 }
 0x17c   : > { %v590_v35 = vsub.f32 1.0, %v589_v31 }
 0x17e   : > { %v591_v45 = vmul.f32 %v1503_v30, %v590_v35 }
 0x17f   : > { %v1505_v33 = vpop.eup %1504 }
 0x180   : > { %v569_v34 = vmul.f32 %v1505_v33, %v567_v24  ;;  %vm574_vm14 = vweird.f32 %v1505_v33  ;;  %v592_v56 = vadd.f32 %v1503_v30, %v591_v45 }
 0x181   : > { %vm575_vm0 = vmor %vm573_vm15, %vm574_vm14 }
 0x182   : > { %v570_v36 = vsub.f32 1.0, %v569_v34  ;;  %v596_v3 = vsel %vm595_vm5, %v1503_v30, %v592_v56  ;;  %v1401_v30 = vld [vmem:[%s1644_s24 + $0x30] sm:$0xff] }
 0x183   : > { %v601_v57 = vsel %vm598_vm6, %v600_v5, %v596_v3 }
 0x184   : > { %v571_v41 = vmul.f32 %v1505_v33, %v570_v36  ;;  %v606_v7 = vsub.f32 1.0, %v601_v57  ;;  %v608_v19 = vmul.f32 %v601_v57, %v1968_v52 }
 0x186   : > { %v572_v46 = vadd.f32 %v1505_v33, %v571_v41 }
 0x188   : > { %v576_v53 = vsel %vm575_vm0, %v1505_v33, %v572_v46  ;;  %v1402_v33 = vld [vmem:[%s1644_s24 + $0x38] sm:$0xff] }
 0x189   : > { %v581_v10 = vsel %vm578_vm1, %v580_v47, %v576_v53  ;;  %vm904_vm1 = vcmp.gt.s32.totalorder %v1791_v49, 4  ;;  %v1408_v49 = vld [vmem:[%s1644_s24 + $0x58] sm:$0xff] }
 0x18a   : > { %v603_v59 = vmul.f32 %v581_v10, %v560_v48 }
 0x18c   : > { %v604_v1 = vadd.f32 %v1398_v55, %v603_v59 }
 0x18e   : > { %1506 = vtanh.f32 %v604_v1 }
 0x194   : > { %v1507_v13 = vpop.eup %1506 }
 0x195   : > { %v607_v14 = vmul.f32 %v1507_v13, %v606_v7 }
 0x197   : > { %v609_v24 = vadd.f32 %v608_v19, %v607_v14 }
 0x199   : > { %v2010_v16 = vsel %vm615_vm7, %v609_v24, %v1968_v52  ;;  %v1403_v24 = vld [vmem:[%s1644_s24 + $0x40] sm:$0xff] }
 0x19a   : > { %v621_v31 = vpack.c.bf16 %v2010_v16, %v2010_v16 }
 0x19c   : > { %630 = vmatmul.bf16.vlgmr.msrb.gmra.mxu2 %v621_v31  ;;  %643 = vmatmul.bf16.vlgmr.msrb.gmra.mxu3 %v621_v31 }
 0x19d   : > { %656 = vmatmul.bf16.vlgmr.msra.gmra.mxu0 %v621_v31  ;;  %844 = vmatpush.bf16.msrb.mxu2 %v1715_v23 }
 0x19e   : > { %916 = vmatpush.bf16.msrb.mxu3 %v1658_v4  ;;  %929 = vmatpush.bf16.msra.mxu0 %v1669_v8 }
 0x1a1   : > { %845 = vmatpush.bf16.msrb.mxu2 %v1730_v28 }
 0x1a2   : > { %917 = vmatpush.bf16.msrb.mxu3 %v1678_v11  ;;  %930 = vmatpush.bf16.msra.mxu0 %v1682_v12 }
 0x1a5   : > { %846 = vmatpush.bf16.msrb.mxu2 %v1758_v37 }
 0x1a6   : > { %918 = vmatpush.bf16.msrb.mxu3 %v1700_v18  ;;  %931 = vmatpush.bf16.msra.mxu0 %v1707_v20 }
 0x1a9   : > { %847 = vmatpush.bf16.msrb.mxu2 %v1795_v50 }
 0x1aa   : > { %919 = vmatpush.bf16.msrb.mxu3 %v1733_v29  ;;  %932 = vmatpush.bf16.msra.mxu0 %v1743_v32 }
 0x1ad   : > { %848 = vmatpush.bf16.msrb.mxu2 %v1825_v60 }
 0x1ae   : > { %920 = vmatpush.bf16.msrb.mxu3 %v1763_v40  ;;  %933 = vmatpush.bf16.msra.mxu0 %v1773_v43 }
 0x1b1   : > { %849 = vmatpush.bf16.msrb.mxu2 %v1854_v6 }
 0x1b2   : > { %921 = vmatpush.bf16.msrb.mxu3 %v1798_v51  ;;  %934 = vmatpush.bf16.msra.mxu0 %v1809_v54 }
 0x1b5   : > { %850 = vmatpush.bf16.msrb.mxu2 %v1878_v17 }
 0x1b6   : > { %922 = vmatpush.bf16.msrb.mxu3 %v1828_v61  ;;  %935 = vmatpush.bf16.msra.mxu0 %v1839_v0 }
 0x1b9   : > { %851 = vmatpush.bf16.msrb.mxu2 %v1894_v22 }
 0x1ba   : > { %923 = vmatpush.bf16.msrb.mxu3 %v1858_v9  ;;  %936 = vmatpush.bf16.msra.mxu0 %v1873_v15 }
 0x21a   : > { %v657_v52 = vpop.f32.mrf.mxu0 }
 0x21b   : > { %v658_v19 = vadd.f32 %v657_v52, %v1962_v63  ;;  %v712_v52 = vpop.permute.xlu1 %711 }
 0x21c   : > { %vm713_vm0 = vcmp.eq.s32.totalorder %v712_v52, 1 }
 0x21f   : > { %v631_v25 = vpop.f32.mrf.mxu2  ;;  %v644_v34 = vpop.f32.mrf.mxu3 }
 0x220   : > { %v632_v35 = vadd.f32 %v631_v25, %v1954_v26  ;;  %v645_v36 = vadd.f32 %v644_v34, %v1956_v27 }
 0x222   : > { %v661_v39 = vadd.f32 %v1401_v30, %v632_v35  ;;  %v681_v41 = vadd.f32 %v1402_v33, %v645_v36  ;;  %v659_v42 = vpop.f32.mrf.mxu0 }
 0x224   : > { %v1404_v44 = vmul.f32 -1.442695, %v661_v39  ;;  %v1405_v45 = vmul.f32 -1.442695, %v681_v41 }
 0x226   : > { %1508 = vpow2.f32 %v1404_v44 }
 0x227   : > { %1510 = vpow2.f32 %v1405_v45  ;;  %v633_v46 = vpop.f32.mrf.mxu2  ;;  %v646_v47 = vpop.f32.mrf.mxu3 }
 0x22c   : > { %v1509_v48 = vpop.eup %1508 }
 0x22d   : > { %v1511_v53 = vpop.eup %1510  ;;  %v665_v10 = vadd.f32 1.0, %v1509_v48 }
 0x22e   : > { %v685_v55 = vadd.f32 1.0, %v1511_v53 }
 0x22f   : > { %1512 = vrcp.f32 %v665_v10  ;;  %v677_v2 = vand.u32 2147483648, %v665_v10  ;;  %v675_v57 = vand.u32 2147483647, %v665_v10  ;;  %vm671_vm9 = vweird.f32 %v665_v10 }
 0x230   : > { %1514 = vrcp.f32 %v685_v55  ;;  %v697_v25 = vand.u32 2147483648, %v685_v55  ;;  %vm691_vm13 = vweird.f32 %v685_v55  ;;  %v695_v34 = vand.u32 2147483647, %v685_v55 }
 0x231   : > { %v678_v14 = vor.u32 1.1754944e-38, %v677_v2  ;;  %vm676_vm11 = vcmp.eq.f32.partialorder %v675_v57, 8.507059e+37 }
 0x232   : > { %v698_v39 = vor.u32 1.1754944e-38, %v697_v25  ;;  %vm696_vm15 = vcmp.eq.f32.partialorder %v695_v34, 8.507059e+37 }
 0x235   : > { %v1513_v56 = vpop.eup %1512 }
 0x236   : > { %v1515_v58 = vpop.eup %1514  ;;  %v667_v59 = vmul.f32 %v1513_v56, %v665_v10  ;;  %vm672_vm8 = vweird.f32 %v1513_v56 }
 0x237   : > { %v687_v62 = vmul.f32 %v1515_v58, %v685_v55  ;;  %vm673_vm10 = vmor %vm671_vm9, %vm672_vm8  ;;  %vm692_vm12 = vweird.f32 %v1515_v58 }
 0x238   : > { %v668_v1 = vsub.f32 1.0, %v667_v59  ;;  %vm693_vm14 = vmor %vm691_vm13, %vm692_vm12  ;;  %v1407_v59 = vld [vmem:[%s1644_s24 + $0x50] sm:$0xff] }
 0x239   : > { %v688_v3 = vsub.f32 1.0, %v687_v62 }
 0x23a   : > { %v669_v5 = vmul.f32 %v1513_v56, %v668_v1 }
 0x23b   : > { %v689_v7 = vmul.f32 %v1515_v58, %v688_v3 }
 0x23c   : > { %v670_v13 = vadd.f32 %v1513_v56, %v669_v5 }
 0x23d   : > { %v690_v30 = vadd.f32 %v1515_v58, %v689_v7 }
 0x23e   : > { %v674_v21 = vsel %vm673_vm10, %v1513_v56, %v670_v13 }
 0x23f   : > { %v679_v31 = vsel %vm676_vm11, %v678_v14, %v674_v21  ;;  %v694_v36 = vsel %vm693_vm14, %v1515_v58, %v690_v30 }
 0x240   : > { %v701_v33 = vmul.f32 %v679_v31, %v658_v19  ;;  %v699_v41 = vsel %vm696_vm15, %v698_v39, %v694_v36  ;;  %v905_v31 = vsel %vm904_vm1, 1, %v1593_v38  ;;  %v1003_v39 = vsel %vm1002_vm2, 1, %v1593_v38 }
 0x241   : > { %v704_v42 = vsub.f32 1.0, %v699_v41  ;;  %v706_v46 = vmul.f32 %v699_v41, %v2010_v16  ;;  %907 = vperm.xlu2 %1487, %v905_v31  }
 0x242   : > { %v702_v35 = vadd.f32 %v1403_v24, %v701_v33 }
 0x244   : > { %1516 = vtanh.f32 %v702_v35 }
 0x249   : > { %1005 = vperm.xlu2 %1487, %v1003_v39  }
 0x24a   : > { %v1517_v44 = vpop.eup %1516 }
 0x24b   : > { %v705_v45 = vmul.f32 %v1517_v44, %v704_v42 }
 0x24d   : > { %v707_v47 = vadd.f32 %v706_v46, %v705_v45 }
 0x24f   : > { %v2046_v48 = vsel %vm713_vm0, %v707_v47, %v2010_v16  ;;  %v1406_v16 = vld [vmem:[%s1644_s24 + $0x48] sm:$0xff] }
 0x250   : > { %v719_v53 = vpack.c.bf16 %v2046_v48, %v2046_v48 }
 0x252   : > { %728 = vmatmul.bf16.vlgmr.msra.gmra.mxu1 %v719_v53  ;;  %741 = vmatmul.bf16.vlgmr.msra.gmra.mxu2 %v719_v53 }
 0x253   : > { %754 = vmatmul.bf16.vlgmr.msra.gmra.mxu3 %v719_v53  ;;  %942 = vmatpush.bf16.msra.mxu1 %v1715_v23 }
 0x254   : > { %1014 = vmatpush.bf16.msra.mxu2 %v1658_v4  ;;  %1027 = vmatpush.bf16.msra.mxu3 %v1669_v8 }
 0x257   : > { %943 = vmatpush.bf16.msra.mxu1 %v1730_v28 }
 0x258   : > { %1015 = vmatpush.bf16.msra.mxu2 %v1678_v11  ;;  %1028 = vmatpush.bf16.msra.mxu3 %v1682_v12 }
 0x25b   : > { %944 = vmatpush.bf16.msra.mxu1 %v1758_v37 }
 0x25c   : > { %1016 = vmatpush.bf16.msra.mxu2 %v1700_v18  ;;  %1029 = vmatpush.bf16.msra.mxu3 %v1707_v20 }
 0x25f   : > { %945 = vmatpush.bf16.msra.mxu1 %v1795_v50 }
 0x260   : > { %1017 = vmatpush.bf16.msra.mxu2 %v1733_v29  ;;  %1030 = vmatpush.bf16.msra.mxu3 %v1743_v32 }
 0x263   : > { %946 = vmatpush.bf16.msra.mxu1 %v1825_v60 }
 0x264   : > { %1018 = vmatpush.bf16.msra.mxu2 %v1763_v40  ;;  %1031 = vmatpush.bf16.msra.mxu3 %v1773_v43 }
 0x267   : > { %947 = vmatpush.bf16.msra.mxu1 %v1854_v6 }
 0x268   : > { %1019 = vmatpush.bf16.msra.mxu2 %v1798_v51  ;;  %1032 = vmatpush.bf16.msra.mxu3 %v1809_v54 }
 0x26b   : > { %948 = vmatpush.bf16.msra.mxu1 %v1878_v17 }
 0x26c   : > { %1020 = vmatpush.bf16.msra.mxu2 %v1828_v61  ;;  %1033 = vmatpush.bf16.msra.mxu3 %v1839_v0 }
 0x26f   : > { %949 = vmatpush.bf16.msra.mxu1 %v1894_v22 }
 0x270   : > { %1021 = vmatpush.bf16.msra.mxu2 %v1858_v9  ;;  %1034 = vmatpush.bf16.msra.mxu3 %v1873_v15 }
 0x2cf   : > { %v729_v10 = vpop.f32.mrf.mxu1 }
 0x2d0   : > { %v730_v55 = vadd.f32 %v729_v10, %v1954_v26 }
 0x2d2   : > { %v759_v56 = vadd.f32 %v1406_v16, %v730_v55 }
 0x2d4   : > { %v1409_v58 = vmul.f32 -1.442695, %v759_v56 }
 0x2d5   : > { %v742_v62 = vpop.f32.mrf.mxu2 }
 0x2d6   : > { %1518 = vpow2.f32 %v1409_v58  ;;  %v743_v1 = vadd.f32 %v742_v62, %v1956_v27  ;;  %v755_v2 = vpop.f32.mrf.mxu3 }
 0x2d7   : > { %v731_v3 = vpop.f32.mrf.mxu1  ;;  %v756_v46 = vadd.f32 %v755_v2, %v1962_v63 }
 0x2d8   : > { %v779_v5 = vadd.f32 %v1407_v59, %v743_v1 }
 0x2da   : > { %v1410_v57 = vmul.f32 -1.442695, %v779_v5 }
 0x2dc   : > { %v1519_v7 = vpop.eup %1518  ;;  %1520 = vpow2.f32 %v1410_v57 }
 0x2dd   : > { %v763_v13 = vadd.f32 1.0, %v1519_v7  ;;  %v744_v14 = vpop.f32.mrf.mxu2  ;;  %v810_v7 = vpop.permute.xlu1 %809 }
 0x2de   : > { %v757_v19 = vpop.f32.mrf.mxu3  ;;  %vm811_vm11 = vcmp.eq.s32.totalorder %v810_v7, 1 }
 0x2df   : > { %1522 = vrcp.f32 %v763_v13  ;;  %v775_v34 = vand.u32 2147483648, %v763_v13  ;;  %v773_v36 = vand.u32 2147483647, %v763_v13  ;;  %vm769_vm4 = vweird.f32 %v763_v13 }
 0x2e1   : > { %v776_v52 = vor.u32 1.1754944e-38, %v775_v34  ;;  %vm774_vm6 = vcmp.eq.f32.partialorder %v773_v36, 8.507059e+37 }
 0x2e2   : > { %v1521_v21 = vpop.eup %1520 }
 0x2e3   : > { %v783_v24 = vadd.f32 1.0, %v1521_v21 }
 0x2e5   : > { %v1523_v30 = vpop.eup %1522  ;;  %1524 = vrcp.f32 %v783_v24  ;;  %v795_v10 = vand.u32 2147483648, %v783_v24  ;;  %v793_v56 = vand.u32 2147483647, %v783_v24  ;;  %vm789_vm8 = vweird.f32 %v783_v24 }
 0x2e6   : > { %v765_v25 = vmul.f32 %v1523_v30, %v763_v13  ;;  %vm770_vm3 = vweird.f32 %v1523_v30 }
 0x2e7   : > { %vm771_vm5 = vmor %vm769_vm4, %vm770_vm3  ;;  %v796_v59 = vor.u32 1.1754944e-38, %v795_v10  ;;  %vm794_vm10 = vcmp.eq.f32.partialorder %v793_v56, 8.507059e+37 }
 0x2e8   : > { %v766_v33 = vsub.f32 1.0, %v765_v25 }
 0x2ea   : > { %v767_v35 = vmul.f32 %v1523_v30, %v766_v33 }
 0x2eb   : > { %v1525_v41 = vpop.eup %1524 }
 0x2ec   : > { %v785_v42 = vmul.f32 %v1525_v41, %v783_v24  ;;  %v768_v44 = vadd.f32 %v1523_v30, %v767_v35  ;;  %vm790_vm7 = vweird.f32 %v1525_v41 }
 0x2ed   : > { %vm791_vm9 = vmor %vm789_vm8, %vm790_vm7 }
 0x2ee   : > { %v786_v45 = vsub.f32 1.0, %v785_v42  ;;  %v772_v47 = vsel %vm771_vm5, %v1523_v30, %v768_v44 }
 0x2ef   : > { %v777_v53 = vsel %vm774_vm6, %v776_v52, %v772_v47 }
 0x2f0   : > { %v787_v16 = vmul.f32 %v1525_v41, %v786_v45  ;;  %v799_v55 = vmul.f32 %v777_v53, %v756_v46  ;;  %v1413_v46 = vld [vmem:[%s1644_s24 + $0x70] sm:$0xff] }
 0x2f2   : > { %v788_v38 = vadd.f32 %v1525_v41, %v787_v16  ;;  %v800_v58 = vadd.f32 %v1408_v49, %v799_v55 }
 0x2f4   : > { %v792_v62 = vsel %vm791_vm9, %v1525_v41, %v788_v38  ;;  %1526 = vtanh.f32 %v800_v58 }
 0x2f5   : > { %v797_v1 = vsel %vm794_vm10, %v796_v59, %v792_v62 }
 0x2f6   : > { %v802_v3 = vsub.f32 1.0, %v797_v1  ;;  %v804_v57 = vmul.f32 %v797_v1, %v2046_v48  ;;  %v908_v1 = vpop.permute.xlu2 %907 }
 0x2f7   : > { %vm909_vm4 = vcmp.eq.s32.totalorder %v908_v1, 1 }
 0x2fa   : > { %v1527_v2 = vpop.eup %1526 }
 0x2fb   : > { %v803_v5 = vmul.f32 %v1527_v2, %v802_v3 }
 0x2fd   : > { %v805_v13 = vadd.f32 %v804_v57, %v803_v5 }
 0x2ff   : > { %v2086_v14 = vsel %vm811_vm11, %v805_v13, %v2046_v48  ;;  %v1417_v13 = vld [vmem:[%s1644_s24 + $0x80] sm:$0xff] }
 0x300   : > { %v817_v19 = vpack.c.bf16 %v2086_v14, %v2086_v14 }
 0x302   : > { %826 = vmatmul.bf16.vlgmr.msrb.gmra.mxu0 %v817_v19  ;;  %839 = vmatmul.bf16.vlgmr.msrb.gmra.mxu1 %v817_v19 }
 0x303   : > { %852 = vmatmul.bf16.vlgmr.msrb.gmra.mxu2 %v817_v19  ;;  %1040 = vmatpush.bf16.msrb.mxu0 %v1715_v23 }
 0x304   : > { %1112 = vmatpush.bf16.msrb.mxu1 %v1658_v4  ;;  %1125 = vmatpush.bf16.msrb.mxu2 %v1669_v8  ;;  %v1411_v4 = vld [vmem:[%s1644_s24 + $0x60] sm:$0xff] }
 0x307   : > { %1041 = vmatpush.bf16.msrb.mxu0 %v1730_v28 }
 0x308   : > { %1113 = vmatpush.bf16.msrb.mxu1 %v1678_v11  ;;  %1126 = vmatpush.bf16.msrb.mxu2 %v1682_v12  ;;  %v1412_v11 = vld [vmem:[%s1644_s24 + $0x68] sm:$0xff] }
 0x30b   : > { %1042 = vmatpush.bf16.msrb.mxu0 %v1758_v37 }
 0x30c   : > { %1114 = vmatpush.bf16.msrb.mxu1 %v1700_v18  ;;  %1127 = vmatpush.bf16.msrb.mxu2 %v1707_v20 }
 0x30f   : > { %1043 = vmatpush.bf16.msrb.mxu0 %v1795_v50 }
 0x310   : > { %1115 = vmatpush.bf16.msrb.mxu1 %v1733_v29  ;;  %1128 = vmatpush.bf16.msrb.mxu2 %v1743_v32 }
 0x313   : > { %1044 = vmatpush.bf16.msrb.mxu0 %v1825_v60 }
 0x314   : > { %1116 = vmatpush.bf16.msrb.mxu1 %v1763_v40  ;;  %1129 = vmatpush.bf16.msrb.mxu2 %v1773_v43 }
 0x317   : > { %1045 = vmatpush.bf16.msrb.mxu0 %v1854_v6 }
 0x318   : > { %1117 = vmatpush.bf16.msrb.mxu1 %v1798_v51  ;;  %1130 = vmatpush.bf16.msrb.mxu2 %v1809_v54 }
 0x31b   : > { %1046 = vmatpush.bf16.msrb.mxu0 %v1878_v17 }
 0x31c   : > { %1118 = vmatpush.bf16.msrb.mxu1 %v1828_v61  ;;  %1131 = vmatpush.bf16.msrb.mxu2 %v1839_v0 }
 0x31f   : > { %1047 = vmatpush.bf16.msrb.mxu0 %v1894_v22 }
 0x320   : > { %1119 = vmatpush.bf16.msrb.mxu1 %v1858_v9  ;;  %1132 = vmatpush.bf16.msrb.mxu2 %v1873_v15 }
 0x37f   : > { %v827_v8 = vpop.f32.mrf.mxu0  ;;  %v840_v12 = vpop.f32.mrf.mxu1 }
 0x380   : > { %v828_v18 = vadd.f32 %v827_v8, %v1954_v26  ;;  %v841_v20 = vadd.f32 %v840_v12, %v1956_v27 }
 0x382   : > { %v857_v29 = vadd.f32 %v1411_v4, %v828_v18  ;;  %v877_v32 = vadd.f32 %v1412_v11, %v841_v20 }
 0x384   : > { %v1414_v40 = vmul.f32 -1.442695, %v857_v29  ;;  %v1415_v43 = vmul.f32 -1.442695, %v877_v32 }
 0x386   : > { %1528 = vpow2.f32 %v1414_v40  ;;  %v853_v51 = vpop.f32.mrf.mxu2 }
 0x387   : > { %1530 = vpow2.f32 %v1415_v43  ;;  %v829_v54 = vpop.f32.mrf.mxu0  ;;  %v842_v61 = vpop.f32.mrf.mxu1  ;;  %v854_v52 = vadd.f32 %v853_v51, %v1962_v63 }
 0x38c   : > { %v1529_v0 = vpop.eup %1528 }
 0x38d   : > { %v1531_v9 = vpop.eup %1530  ;;  %v861_v15 = vadd.f32 1.0, %v1529_v0 }
 0x38e   : > { %v881_v48 = vadd.f32 1.0, %v1531_v9  ;;  %v855_v21 = vpop.f32.mrf.mxu2 }
 0x38f   : > { %1532 = vrcp.f32 %v861_v15  ;;  %v873_v35 = vand.u32 2147483648, %v861_v15  ;;  %v871_v39 = vand.u32 2147483647, %v861_v15  ;;  %vm867_vm13 = vweird.f32 %v861_v15 }
 0x390   : > { %1534 = vrcp.f32 %v881_v48  ;;  %v893_v16 = vand.u32 2147483648, %v881_v48  ;;  %vm887_vm1 = vweird.f32 %v881_v48  ;;  %v891_v10 = vand.u32 2147483647, %v881_v48 }
 0x391   : > { %v874_v44 = vor.u32 1.1754944e-38, %v873_v35  ;;  %vm872_vm15 = vcmp.eq.f32.partialorder %v871_v39, 8.507059e+37 }
 0x392   : > { %v894_v38 = vor.u32 1.1754944e-38, %v893_v16  ;;  %vm892_vm3 = vcmp.eq.f32.partialorder %v891_v10, 8.507059e+37 }
 0x395   : > { %v1533_v24 = vpop.eup %1532 }
 0x396   : > { %v1535_v31 = vpop.eup %1534  ;;  %v863_v30 = vmul.f32 %v1533_v24, %v861_v15  ;;  %vm868_vm12 = vweird.f32 %v1533_v24 }
 0x397   : > { %v883_v25 = vmul.f32 %v1535_v31, %v881_v48  ;;  %vm869_vm14 = vmor %vm867_vm13, %vm868_vm12  ;;  %vm888_vm0 = vweird.f32 %v1535_v31 }
 0x398   : > { %v864_v33 = vsub.f32 1.0, %v863_v30  ;;  %vm889_vm2 = vmor %vm887_vm1, %vm888_vm0 }
 0x399   : > { %v884_v34 = vsub.f32 1.0, %v883_v25 }
 0x39a   : > { %v865_v36 = vmul.f32 %v1533_v24, %v864_v33  ;;  %v1418_v33 = vld [vmem:[%s1644_s24 + $0x88] sm:$0xff] }
 0x39b   : > { %v885_v41 = vmul.f32 %v1535_v31, %v884_v34 }
 0x39c   : > { %v866_v42 = vadd.f32 %v1533_v24, %v865_v36 }
 0x39d   : > { %v886_v49 = vadd.f32 %v1535_v31, %v885_v41 }
 0x39e   : > { %v870_v45 = vsel %vm869_vm14, %v1533_v24, %v866_v42 }
 0x39f   : > { %v875_v47 = vsel %vm872_vm15, %v874_v44, %v870_v45  ;;  %v890_v56 = vsel %vm889_vm2, %v1535_v31, %v886_v49 }
 0x3a0   : > { %v897_v53 = vmul.f32 %v875_v47, %v854_v52  ;;  %v895_v58 = vsel %vm892_vm3, %v894_v38, %v890_v56  ;;  %v1006_v47 = vpop.permute.xlu2 %1005  ;;  %v1421_v38 = vld [vmem:[%s1644_s24 + $0x90] sm:$0xff] }
 0x3a1   : > { %v900_v59 = vsub.f32 1.0, %v895_v58  ;;  %v902_v2 = vmul.f32 %v895_v58, %v2086_v14  ;;  %vm1007_vm13 = vcmp.eq.s32.totalorder %v1006_v47, 1  ;;  %v1427_v47 = vld [vmem:[%s1644_s24 + $0xb0] sm:$0xff] }
 0x3a2   : > { %v898_v55 = vadd.f32 %v1413_v46, %v897_v53 }
 0x3a4   : > { %1536 = vtanh.f32 %v898_v55 }
 0x3aa   : > { %v1537_v62 = vpop.eup %1536 }
 0x3ab   : > { %v901_v3 = vmul.f32 %v1537_v62, %v900_v59  ;;  %v1422_v59 = vld [vmem:[%s1644_s24 + $0x98] sm:$0xff] }
 0x3ad   : > { %v903_v5 = vadd.f32 %v902_v2, %v901_v3 }
 0x3af   : > { %v2122_v57 = vsel %vm909_vm4, %v903_v5, %v2086_v14 }
 0x3b0   : > { %v915_v7 = vpack.c.bf16 %v2122_v57, %v2122_v57 }
 0x3b2   : > { %924 = vmatmul.bf16.vlgmr.msrb.gmra.mxu3 %v915_v7  ;;  %937 = vmatmul.bf16.vlgmr.msra.gmra.mxu0 %v915_v7 }
 0x3b3   : > { %950 = vmatmul.bf16.vlgmr.msra.gmra.mxu1 %v915_v7  ;;  %1138 = vmatpush.bf16.msrb.mxu3 %v1715_v23 }
 0x3b7   : > { %1139 = vmatpush.bf16.msrb.mxu3 %v1730_v28  ;;  %v1416_v28 = vld [vmem:[%s1644_s24 + $0x78] sm:$0xff] }
 0x3bb   : > { %1140 = vmatpush.bf16.msrb.mxu3 %v1758_v37 }
 0x3bf   : > { %1141 = vmatpush.bf16.msrb.mxu3 %v1795_v50 }
 0x3c3   : > { %1142 = vmatpush.bf16.msrb.mxu3 %v1825_v60 }
 0x3c7   : > { %1143 = vmatpush.bf16.msrb.mxu3 %v1854_v6 }
 0x3cb   : > { %1144 = vmatpush.bf16.msrb.mxu3 %v1878_v17 }
 0x3cf   : > { %1145 = vmatpush.bf16.msrb.mxu3 %v1894_v22 }
 0x42f   : > { %v938_v14 = vpop.f32.mrf.mxu0 }
 0x430   : > { %v939_v19 = vadd.f32 %v938_v14, %v1956_v27  ;;  %v951_v4 = vpop.f32.mrf.mxu1 }
 0x431   : > { %v952_v31 = vadd.f32 %v951_v4, %v1962_v63 }
 0x432   : > { %v975_v23 = vadd.f32 %v1417_v13, %v939_v19 }
 0x434   : > { %v1420_v8 = vmul.f32 -1.442695, %v975_v23 }
 0x435   : > { %v925_v11 = vpop.f32.mrf.mxu3 }
 0x436   : > { %1538 = vpow2.f32 %v1420_v8  ;;  %v926_v37 = vadd.f32 %v925_v11, %v1954_v26 }
 0x437   : > { %v940_v50 = vpop.f32.mrf.mxu0 }
 0x438   : > { %v955_v60 = vadd.f32 %v1416_v28, %v926_v37  ;;  %v953_v12 = vpop.f32.mrf.mxu1 }
 0x43a   : > { %v1419_v6 = vmul.f32 -1.442695, %v955_v60 }
 0x43c   : > { %v1539_v18 = vpop.eup %1538  ;;  %1540 = vpow2.f32 %v1419_v6 }
 0x43d   : > { %v979_v17 = vadd.f32 1.0, %v1539_v18  ;;  %v927_v22 = vpop.f32.mrf.mxu3 }
 0x43f   : > { %1542 = vrcp.f32 %v979_v17  ;;  %v991_v35 = vand.u32 2147483648, %v979_v17  ;;  %vm985_vm10 = vweird.f32 %v979_v17  ;;  %v989_v39 = vand.u32 2147483647, %v979_v17 }
 0x441   : > { %v992_v44 = vor.u32 1.1754944e-38, %v991_v35  ;;  %vm990_vm12 = vcmp.eq.f32.partialorder %v989_v39, 8.507059e+37 }
 0x442   : > { %v1541_v20 = vpop.eup %1540 }
 0x443   : > { %v959_v29 = vadd.f32 1.0, %v1541_v20 }
 0x445   : > { %1544 = vrcp.f32 %v959_v29  ;;  %v1543_v32 = vpop.eup %1542  ;;  %v971_v0 = vand.u32 2147483648, %v959_v29  ;;  %v969_v15 = vand.u32 2147483647, %v959_v29  ;;  %vm965_vm6 = vweird.f32 %v959_v29 }
 0x446   : > { %v981_v40 = vmul.f32 %v1543_v32, %v979_v17  ;;  %vm986_vm9 = vweird.f32 %v1543_v32 }
 0x447   : > { %v972_v24 = vor.u32 1.1754944e-38, %v971_v0  ;;  %vm970_vm8 = vcmp.eq.f32.partialorder %v969_v15, 8.507059e+37  ;;  %vm987_vm11 = vmor %vm985_vm10, %vm986_vm9 }
 0x448   : > { %v982_v54 = vsub.f32 1.0, %v981_v40 }
 0x44a   : > { %v983_v48 = vmul.f32 %v1543_v32, %v982_v54 }
 0x44b   : > { %v1545_v43 = vpop.eup %1544 }
 0x44c   : > { %v961_v51 = vmul.f32 %v1545_v43, %v959_v29  ;;  %vm966_vm5 = vweird.f32 %v1545_v43  ;;  %v984_v25 = vadd.f32 %v1543_v32, %v983_v48 }
 0x44d   : > { %vm967_vm7 = vmor %vm965_vm6, %vm966_vm5 }
 0x44e   : > { %v962_v61 = vsub.f32 1.0, %v961_v51  ;;  %v988_v42 = vsel %vm987_vm11, %v1543_v32, %v984_v25  ;;  %v1423_v51 = vld [vmem:[%s1644_s24 + $0xa0] sm:$0xff] }
 0x44f   : > { %v993_v52 = vsel %vm990_vm12, %v992_v44, %v988_v42  ;;  %v1426_v42 = vld [vmem:[%s1644_s24 + $0xa8] sm:$0xff] }
 0x450   : > { %v963_v9 = vmul.f32 %v1545_v43, %v962_v61  ;;  %v998_v45 = vsub.f32 1.0, %v993_v52  ;;  %v1000_v53 = vmul.f32 %v993_v52, %v2122_v57 }
 0x452   : > { %v964_v21 = vadd.f32 %v1545_v43, %v963_v9 }
 0x454   : > { %v968_v30 = vsel %vm967_vm7, %v1545_v43, %v964_v21 }
 0x455   : > { %v973_v34 = vsel %vm970_vm8, %v972_v24, %v968_v30 }
 0x456   : > { %v995_v36 = vmul.f32 %v973_v34, %v952_v31 }
 0x458   : > { %v996_v41 = vadd.f32 %v1418_v33, %v995_v36  ;;  %v1104_v33 = vpop.permute.xlu0 %1103 }
 0x459   : > { %vm1105_vm6 = vcmp.eq.s32.totalorder %v1104_v33, 1 }
 0x45a   : > { %1546 = vtanh.f32 %v996_v41 }
 0x460   : > { %v1547_v46 = vpop.eup %1546 }
 0x461   : > { %v999_v49 = vmul.f32 %v1547_v46, %v998_v45 }
 0x463   : > { %v1001_v16 = vadd.f32 %v1000_v53, %v999_v49 }
 0x465   : > { %v2142_v10 = vsel %vm1007_vm13, %v1001_v16, %v2122_v57 }
 0x466   : > { %v1013_v55 = vpack.c.bf16 %v2142_v10, %v2142_v10 }
 0x468   : > { %1022 = vmatmul.bf16.vlgmr.msra.gmra.mxu2 %v1013_v55  ;;  %1035 = vmatmul.bf16.vlgmr.msra.gmra.mxu3 %v1013_v55 }
 0x469   : > { %1048 = vmatmul.bf16.vlgmr.msrb.gmra.mxu0 %v1013_v55 }
 0x4e6   : > { %v1049_v56 = vpop.f32.mrf.mxu0 }
 0x4e7   : > { %v1050_v40 = vadd.f32 %v1049_v56, %v1962_v63 }
 0x4eb   : > { %v1023_v58 = vpop.f32.mrf.mxu2  ;;  %v1036_v62 = vpop.f32.mrf.mxu3 }
 0x4ec   : > { %v1024_v1 = vadd.f32 %v1023_v58, %v1954_v26  ;;  %v1037_v3 = vadd.f32 %v1036_v62, %v1956_v27 }
 0x4ee   : > { %v1053_v2 = vadd.f32 %v1421_v38, %v1024_v1  ;;  %v1073_v5 = vadd.f32 %v1422_v59, %v1037_v3  ;;  %v1051_v7 = vpop.f32.mrf.mxu0 }
 0x4f0   : > { %v1424_v57 = vmul.f32 -1.442695, %v1053_v2  ;;  %v1425_v13 = vmul.f32 -1.442695, %v1073_v5 }
 0x4f2   : > { %1548 = vpow2.f32 %v1424_v57 }
 0x4f3   : > { %1550 = vpow2.f32 %v1425_v13  ;;  %v1025_v14 = vpop.f32.mrf.mxu2  ;;  %v1038_v19 = vpop.f32.mrf.mxu3 }
 0x4f8   : > { %v1549_v4 = vpop.eup %1548 }
 0x4f9   : > { %v1551_v23 = vpop.eup %1550  ;;  %v1057_v8 = vadd.f32 1.0, %v1549_v4 }
 0x4fa   : > { %v1077_v28 = vadd.f32 1.0, %v1551_v23 }
 0x4fb   : > { %1552 = vrcp.f32 %v1057_v8  ;;  %v1069_v6 = vand.u32 2147483648, %v1057_v8  ;;  %v1067_v22 = vand.u32 2147483647, %v1057_v8  ;;  %vm1063_vm15 = vweird.f32 %v1057_v8 }
 0x4fc   : > { %1554 = vrcp.f32 %v1077_v28  ;;  %v1089_v9 = vand.u32 2147483648, %v1077_v28  ;;  %vm1083_vm3 = vweird.f32 %v1077_v28  ;;  %v1087_v15 = vand.u32 2147483647, %v1077_v28 }
 0x4fd   : > { %v1070_v32 = vor.u32 1.1754944e-38, %v1069_v6  ;;  %vm1068_vm1 = vcmp.eq.f32.partialorder %v1067_v22, 8.507059e+37 }
 0x4fe   : > { %v1090_v24 = vor.u32 1.1754944e-38, %v1089_v9  ;;  %vm1088_vm5 = vcmp.eq.f32.partialorder %v1087_v15, 8.507059e+37 }
 0x501   : > { %v1553_v11 = vpop.eup %1552 }
 0x502   : > { %v1555_v37 = vpop.eup %1554  ;;  %v1059_v50 = vmul.f32 %v1553_v11, %v1057_v8  ;;  %vm1064_vm14 = vweird.f32 %v1553_v11 }
 0x503   : > { %v1079_v60 = vmul.f32 %v1555_v37, %v1077_v28  ;;  %vm1065_vm0 = vmor %vm1063_vm15, %vm1064_vm14  ;;  %vm1084_vm2 = vweird.f32 %v1555_v37 }
 0x504   : > { %v1060_v12 = vsub.f32 1.0, %v1059_v50  ;;  %vm1085_vm4 = vmor %vm1083_vm3, %vm1084_vm2 }
 0x505   : > { %v1080_v18 = vsub.f32 1.0, %v1079_v60 }
 0x506   : > { %v1061_v17 = vmul.f32 %v1553_v11, %v1060_v12 }
 0x507   : > { %v1081_v20 = vmul.f32 %v1555_v37, %v1080_v18 }
 0x508   : > { %v1062_v29 = vadd.f32 %v1553_v11, %v1061_v17 }
 0x509   : > { %v1082_v61 = vadd.f32 %v1555_v37, %v1081_v20 }
 0x50a   : > { %v1066_v43 = vsel %vm1065_vm0, %v1553_v11, %v1062_v29  ;;  %v1428_v11 = vld [vmem:[%s1644_s24 + $0xb8] sm:$0xff] }
 0x50b   : > { %v1071_v54 = vsel %vm1068_vm1, %v1070_v32, %v1066_v43  ;;  %v1086_v21 = vsel %vm1085_vm4, %v1555_v37, %v1082_v61 }
 0x50c   : > { %v1093_v0 = vmul.f32 %v1071_v54, %v1050_v40  ;;  %v1091_v31 = vsel %vm1088_vm5, %v1090_v24, %v1086_v21  ;;  %v1202_v40 = vpop.permute.xlu1 %1201 }
 0x50d   : > { %v1096_v30 = vsub.f32 1.0, %v1091_v31  ;;  %v1098_v35 = vmul.f32 %v1091_v31, %v2142_v10  ;;  %vm1203_vm15 = vcmp.eq.s32.totalorder %v1202_v40, 1 }
 0x50e   : > { %v1094_v48 = vadd.f32 %v1423_v51, %v1093_v0 }
 0x510   : > { %1556 = vtanh.f32 %v1094_v48 }
 0x516   : > { %v1557_v25 = vpop.eup %1556 }
 0x517   : > { %v1097_v34 = vmul.f32 %v1557_v25, %v1096_v30 }
 0x519   : > { %v1099_v36 = vadd.f32 %v1098_v35, %v1097_v34 }
 0x51b   : > { %v2154_v39 = vsel %vm1105_vm6, %v1099_v36, %v2142_v10 }
 0x51c   : > { %v1111_v41 = vpack.c.bf16 %v2154_v39, %v2154_v39 }
 0x51e   : > { %1120 = vmatmul.bf16.vlgmr.msrb.gmra.mxu1 %v1111_v41  ;;  %1133 = vmatmul.bf16.vlgmr.msrb.gmra.mxu2 %v1111_v41 }
 0x51f   : > { %1146 = vmatmul.bf16.vlgmr.msrb.gmra.mxu3 %v1111_v41 }
 0x59b   : > { %v1121_v44 = vpop.f32.mrf.mxu1 }
 0x59c   : > { %v1122_v52 = vadd.f32 %v1121_v44, %v1954_v26 }
 0x59e   : > { %v1151_v45 = vadd.f32 %v1426_v42, %v1122_v52 }
 0x5a0   : > { %v1429_v46 = vmul.f32 -1.442695, %v1151_v45 }
 0x5a1   : > { %v1134_v49 = vpop.f32.mrf.mxu2 }
 0x5a2   : > { %1558 = vpow2.f32 %v1429_v46  ;;  %v1135_v53 = vadd.f32 %v1134_v49, %v1956_v27  ;;  %v1147_v16 = vpop.f32.mrf.mxu3 }
 0x5a3   : > { %v1123_v10 = vpop.f32.mrf.mxu1  ;;  %v1148_v8 = vadd.f32 %v1147_v16, %v1962_v63 }
 0x5a4   : > { %v1171_v55 = vadd.f32 %v1427_v47, %v1135_v53 }
 0x5a6   : > { %v1430_v56 = vmul.f32 -1.442695, %v1171_v55 }
 0x5a8   : > { %v1559_v38 = vpop.eup %1558  ;;  %1560 = vpow2.f32 %v1430_v56 }
 0x5a9   : > { %v1155_v58 = vadd.f32 1.0, %v1559_v38  ;;  %v1136_v59 = vpop.f32.mrf.mxu2 }
 0x5aa   : > { %v1149_v62 = vpop.f32.mrf.mxu3 }
 0x5ab   : > { %1562 = vrcp.f32 %v1155_v58  ;;  %v1167_v7 = vand.u32 2147483648, %v1155_v58  ;;  %v1165_v27 = vand.u32 2147483647, %v1155_v58  ;;  %vm1161_vm8 = vweird.f32 %v1155_v58 }
 0x5ad   : > { %v1168_v4 = vor.u32 1.1754944e-38, %v1167_v7  ;;  %vm1166_vm10 = vcmp.eq.f32.partialorder %v1165_v27, 8.507059e+37 }
 0x5ae   : > { %v1561_v1 = vpop.eup %1560 }
 0x5af   : > { %v1175_v3 = vadd.f32 1.0, %v1561_v1 }
 0x5b1   : > { %v1563_v26 = vpop.eup %1562  ;;  %1564 = vrcp.f32 %v1175_v3  ;;  %v1187_v60 = vand.u32 2147483648, %v1175_v3  ;;  %v1185_v6 = vand.u32 2147483647, %v1175_v3  ;;  %vm1181_vm12 = vweird.f32 %v1175_v3 }
 0x5b2   : > { %v1157_v2 = vmul.f32 %v1563_v26, %v1155_v58  ;;  %vm1162_vm7 = vweird.f32 %v1563_v26 }
 0x5b3   : > { %vm1163_vm9 = vmor %vm1161_vm8, %vm1162_vm7  ;;  %v1188_v22 = vor.u32 1.1754944e-38, %v1187_v60  ;;  %vm1186_vm14 = vcmp.eq.f32.partialorder %v1185_v6, 8.507059e+37 }
 0x5b4   : > { %v1158_v5 = vsub.f32 1.0, %v1157_v2 }
 0x5b6   : > { %v1159_v57 = vmul.f32 %v1563_v26, %v1158_v5 }
 0x5b7   : > { %v1565_v13 = vpop.eup %1564 }
 0x5b8   : > { %v1177_v14 = vmul.f32 %v1565_v13, %v1175_v3  ;;  %v1160_v19 = vadd.f32 %v1563_v26, %v1159_v57  ;;  %vm1182_vm11 = vweird.f32 %v1565_v13 }
 0x5b9   : > { %vm1183_vm13 = vmor %vm1181_vm12, %vm1182_vm11 }
 0x5ba   : > { %v1178_v23 = vsub.f32 1.0, %v1177_v14  ;;  %v1164_v28 = vsel %vm1163_vm9, %v1563_v26, %v1160_v19 }
 0x5bb   : > { %v1169_v37 = vsel %vm1166_vm10, %v1168_v4, %v1164_v28 }
 0x5bc   : > { %v1179_v50 = vmul.f32 %v1565_v13, %v1178_v23  ;;  %v1191_v12 = vmul.f32 %v1169_v37, %v1148_v8 }
 0x5be   : > { %v1180_v18 = vadd.f32 %v1565_v13, %v1179_v50  ;;  %v1192_v17 = vadd.f32 %v1428_v11, %v1191_v12 }
 0x5c0   : > { %v1184_v20 = vsel %vm1183_vm13, %v1565_v13, %v1180_v18  ;;  %1566 = vtanh.f32 %v1192_v17 }
 0x5c1   : > { %v1189_v29 = vsel %vm1186_vm14, %v1188_v22, %v1184_v20 }
 0x5c2   : > { %v1194_v32 = vsub.f32 1.0, %v1189_v29  ;;  %v1196_v51 = vmul.f32 %v1189_v29, %v2154_v39 }
 0x5c6   : > { %v1567_v63 = vpop.eup %1566 }
 0x5c7   : > { %v1195_v43 = vmul.f32 %v1567_v63, %v1194_v32 }
 0x5c9   : > { %v1197_v54 = vadd.f32 %v1196_v51, %v1195_v43 }
 0x5cb   : > { %v1204_v61 = vsel %vm1203_vm15, %v1197_v54, %v2154_v39 }
 0x5cc   : > { %1205 = vst [vmem:[%s2182_s4] sm:$0xff] %v1204_v61 }
 0x5cd PF: > { %s14_s17 = sadd.s32 1, %s1590_s17   ;;  %s2183_s15 = smov %s1586_s16 }
 0x5ce   : > { %p11_p6 = scmp.ge.s32.totalorder %s14_s17, 4   ;;  %s2184_s16 = smov %s2186_s18 }
 0x5d0   :  { %13 = sbr.rel (!%p11_p6) target bundleno = 2 (0x2), region = 80 }

</bundles_post_ra>
